<compile_context>
chip_gen: v5e
topology: v5e:2x2
jax: 0.10.0
libtpu: 0.0.40
codegen_flags: <defaults>
</compile_context>

<pallas_src>
import functools

import jax
import jax.numpy as jnp
from jax.experimental import pallas as pl
from jax.experimental.pallas import tpu as pltpu


# --------------------------------------------------------------------------- #
# Pallas kernels
# --------------------------------------------------------------------------- #
def _dw_half_kernel(x_ref, wt_ref, selh_ref, selw_ref, o_ref, *, KH, KW):
    """Depthwise 3x3 / stride-(2,2) conv, pad folded into the selection matrices.

    x_ref   : (1, TC, H, W)     raw (unpadded) input planes, W on the lane axis
    wt_ref  : (1, TC, KH*KW+1)  per-channel f32 taps, bias in the last column
    selh_ref: (KH, Ho, H)       0/1 row selection,    selh[kh, i, p] = [p == 2i+kh-1]
    selw_ref: (KW, W,  Wo)      0/1 column selection, selw[kw, p, j] = [p == 2j+kw-1]
    o_ref   : (1, TC, Ho, Wo)
    """
    _, TC, Ho, Wo = o_ref.shape
    _, _, H, W = x_ref.shape

    X = x_ref[0].astype(jnp.float32)                      # (TC, H, W)
    wt = wt_ref[0]                                        # (TC, KH*KW+1), f32
    selh = selh_ref[...]                                  # (KH, Ho, H)
    selw = selw_ref[...]                                  # (KW, W, Wo)
    Xf = X.reshape(TC * H, W)                             # lane-dense MXU operand

    # Bias folded into the accumulator init.
    acc = jnp.broadcast_to(wt[:, KH * KW][:, None, None], (TC, Ho, Wo))

    for kw in range(KW):                                  # KW = 3: short static unroll
        # Column decimation (implicit zero pad: out-of-range taps have no hit).
        y = jnp.dot(Xf, selw[kw],
                    preferred_element_type=jnp.float32,
                    precision=jax.lax.Precision.HIGHEST).reshape(TC, H, Wo)
        # Per-channel row matrices with the kh taps folded in:
        #   g[c, i, p] = sum_kh w[c, kh, kw] * [p == 2i + kh - 1]
        g = selh[0][None] * wt[:, kw][:, None, None]
        for kh in range(1, KH):
            g = g + selh[kh][None] * wt[:, kh * KW + kw][:, None, None]
        # Row decimation + tap-weighted sum: one batched matmul on the idle MXU.
        acc = acc + jnp.einsum('cih,chj->cij', g, y,
                               preferred_element_type=jnp.float32,
                               precision=jax.lax.Precision.HIGHEST)

    o_ref[0] = acc.astype(o_ref.dtype)


def _dw_time_kernel(x_ref, wt_ref, selh_ref, o_ref, *, KH):
    """Depthwise (3,1) / stride-(2,1) conv, H-pad folded into the row selection.

    x_ref   : (1, TC, H, W)   raw input planes, W on the lane axis
    wt_ref  : (1, TC, KH+1)   per-channel f32 taps, bias in the last column
    selh_ref: (KH, Ho, H)     0/1 row selection
    o_ref   : (1, TC, Ho, W)
    """
    _, TC, Ho, W = o_ref.shape
    X = x_ref[0].astype(jnp.float32)                      # (TC, H, W)
    wt = wt_ref[0]                                        # (TC, KH+1)
    selh = selh_ref[...]                                  # (KH, Ho, H)

    # g[c, i, p] = sum_kh w[c, kh] * [p == 2i + kh - 1]
    g = selh[0][None] * wt[:, 0][:, None, None]
    for kh in range(1, KH):
        g = g + selh[kh][None] * wt[:, kh][:, None, None]

    out = jnp.einsum('cih,chw->ciw', g, X,
                     preferred_element_type=jnp.float32,
                     precision=jax.lax.Precision.HIGHEST)
    out = out + wt[:, KH][:, None, None]                  # bias
    o_ref[0] = out.astype(o_ref.dtype)


# --------------------------------------------------------------------------- #
# Wrapper: channel-tiled pallas_call (no pad pass, no transposes)
# --------------------------------------------------------------------------- #
def _pick_channel_tile(num_channels, plane_f32_bytes, batch,
                       budget_bytes=4 * 1024 * 1024):
    """Largest channel tile dividing C that keeps the f32 working plane under a
    ~4 MiB budget (double-buffered blocks stay far below the 32/48 MiB scoped-VMEM
    ceilings of v5e/v6e/v7x), while keeping >= 2 grid steps when possible so v7x's
    two TensorCores (and the software pipeline) both get work."""
    divisors = [d for d in range(1, num_channels + 1) if num_channels % d == 0]
    fitting = [d for d in divisors if d * plane_f32_bytes <= budget_bytes]
    tc = max(fitting) if fitting else 1
    while tc > 1 and batch * (num_channels // tc) < 2:
        tc = max(d for d in divisors if d < tc)
    return tc


def _depthwise_downsample(x_nchw, w_ckhkw, bias, *, kw_taps):
    """kw_taps=3 -> 'half' (3x3, stride (2,2), pad (1,1));
       kw_taps=1 -> 'timepreserve' ((3,1), stride (2,1), pad (1,0))."""
    N, C, H, W = x_nchw.shape
    KH, KW = 3, kw_taps
    Ho = (H + 2 - KH) // 2 + 1                                # pad_h=1, stride_h=2
    Wo = (W + 2 - KW) // 2 + 1 if KW == 3 else W              # pad_w=1/0, stride_w=2/1

    # 0/1 selection matrices with the conv halo folded in (no jnp.pad HBM pass).
    i_idx = jax.lax.broadcasted_iota(jnp.int32, (Ho, H), 0)
    p_idx = jax.lax.broadcasted_iota(jnp.int32, (Ho, H), 1)
    selh = jnp.stack([(p_idx == 2 * i_idx + kh - 1).astype(jnp.float32)
                      for kh in range(KH)])                   # (KH, Ho, H)

    tc = _pick_channel_tile(C, H * W * 4, N)
    n_taps = KH * KW
    # (C//tc, tc, n_taps+1) f32 tap table -> layout-legal (tc, n_taps+1) blocks.
    wt = jnp.concatenate(
        [w_ckhkw.reshape(C, n_taps), bias.reshape(C, 1)], axis=1
    ).astype(jnp.float32).reshape(C // tc, tc, n_taps + 1)

    x_spec = pl.BlockSpec((1, tc, H, W), lambda n, cb: (n, cb, 0, 0))
    wt_spec = pl.BlockSpec((1, tc, n_taps + 1), lambda n, cb: (cb, 0, 0))
    selh_spec = pl.BlockSpec((KH, Ho, H), lambda n, cb: (0, 0, 0))   # resident block

    if KW == 3:
        q_idx = jax.lax.broadcasted_iota(jnp.int32, (W, Wo), 0)
        j_idx = jax.lax.broadcasted_iota(jnp.int32, (W, Wo), 1)
        selw = jnp.stack([(q_idx == 2 * j_idx + kw - 1).astype(jnp.float32)
                          for kw in range(KW)])               # (KW, W, Wo)
        kernel_fn = functools.partial(_dw_half_kernel, KH=KH, KW=KW)
        in_specs = [x_spec, wt_spec, selh_spec,
                    pl.BlockSpec((KW, W, Wo), lambda n, cb: (0, 0, 0))]
        operands = (x_nchw, wt, selh, selw)
        sel_bytes = selh.size * 4 + selw.size * 4
    else:
        kernel_fn = functools.partial(_dw_time_kernel, KH=KH)
        in_specs = [x_spec, wt_spec, selh_spec]
        operands = (x_nchw, wt, selh)
        sel_bytes = selh.size * 4

    # TODO(synk): for small Wo (< 128 lanes) the output stores are not lane-dense; pad
    # Wo to a multiple of 128 (or flatten Ho*Wo onto lanes) if store DMAs show up.
    # TODO(synk): add H-halo tiling for very large single-channel planes, and a
    # roll-based decimation path if the HIGHEST-precision selection matmuls ever become
    # the critical unit on v5e at very wide inputs.

    flops = 2 * N * C * Ho * Wo * n_taps                      # the conv itself
    if KW == 3:
        flops += 2 * N * C * KW * (H * W * Wo + Ho * H * Wo)  # selection matmuls (MXU)
    else:
        flops += 2 * N * C * Ho * H * W
    bytes_accessed = (x_nchw.size * x_nchw.dtype.itemsize + wt.size * 4 + sel_bytes
                      + N * C * Ho * Wo * x_nchw.dtype.itemsize)

    return pl.pallas_call(
        kernel_fn,
        out_shape=jax.ShapeDtypeStruct((N, C, Ho, Wo), x_nchw.dtype),
        grid=(N, C // tc),
        in_specs=in_specs,
        out_specs=pl.BlockSpec((1, tc, Ho, Wo), lambda n, cb: (n, cb, 0, 0)),
        compiler_params=pltpu.CompilerParams(
            dimension_semantics=("parallel", "parallel"),
            vmem_limit_bytes=40 * 1024 * 1024),
        cost_estimate=pl.CostEstimate(
            flops=flops, transcendentals=0, bytes_accessed=bytes_accessed),
    )(*operands)


# --------------------------------------------------------------------------- #
# Parameter setup (plain JAX glue): deterministic init + spectral normalization.
# --------------------------------------------------------------------------- #
def _spectral_norm(w, key, n_power_iterations=1, eps=1e-12):
    """Mirror torch.nn.utils.spectral_norm forward: divide W by its top singular
    value estimated with one power iteration (deterministic u init)."""
    wm = w.reshape(w.shape[0], -1)
    u = jax.random.normal(key, (wm.shape[0],), dtype=wm.dtype)
    u = u / jnp.maximum(jnp.linalg.norm(u), eps)
    v = None
    for _ in range(n_power_iterations):
        v = wm.T @ u
        v = v / jnp.maximum(jnp.linalg.norm(v), eps)
        u = wm @ v
        u = u / jnp.maximum(jnp.linalg.norm(u), eps)
    sigma = u @ (wm @ v)
    return w / sigma


class LearnedDownSample:
    """JAX/Pallas port of model.discriminator.LearnedDownSample (forward only)."""

    def __init__(self, layer_type, dim_in, key=None):
        self.layer_type = layer_type
        self.dim_in = dim_in
        if layer_type == "none":
            return
        elif layer_type == "timepreserve":
            kh, kw = 3, 1
        elif layer_type == "half":
            kh, kw = 3, 3
        else:
            raise RuntimeError(
                "Got unexpected donwsampletype %s, expected is [none, timepreserve, half]"
                % layer_type)
        if key is None:
            key = jax.random.PRNGKey(42)
        k_w, k_b, k_u = jax.random.split(key, 3)
        fan_in = 1 * kh * kw                      # in_channels / groups = 1
        bound = 1.0 / (fan_in ** 0.5)
        w = jax.random.uniform(k_w, (dim_in, 1, kh, kw), jnp.float32, -bound, bound)
        b = jax.random.uniform(k_b, (dim_in,), jnp.float32, -bound, bound)
        # TODO(synk): torch keeps a persistent power-iteration buffer `u`; here we use a
        # deterministic fresh u per init (forward-only fidelity note, not a kernel issue).
        w = _spectral_norm(w, k_u)
        self.w = w[:, 0, :, :]                    # (C, KH, KW)
        self.b = b
        self.kw_taps = kw

    def __call__(self, x_nchw):
        if self.layer_type == "none":
            return x_nchw
        return _depthwise_downsample(x_nchw, self.w, self.b, kw_taps=self.kw_taps)


# --------------------------------------------------------------------------- #
# Reference (plain JAX) for verification.
# --------------------------------------------------------------------------- #
def _ref_conv(x_nchw, w_ckhkw, bias, stride, padding):
    C = x_nchw.shape[1]
    w_oihw = w_ckhkw[:, None, :, :]                          # (C,1,KH,KW)
    out = jax.lax.conv_general_dilated(
        x_nchw, w_oihw, window_strides=stride, padding=padding,
        dimension_numbers=("NCHW", "OIHW", "NCHW"), feature_group_count=C)
    return out + bias[None, :, None, None]


if __name__ == "__main__":
    key = jax.random.PRNGKey(0)
    x = jax.random.normal(key, (2, 4, 16, 16), jnp.float32)  # NCHW input

    # 'half': depthwise 3x3, stride 2, padding 1
    mod_half = LearnedDownSample("half", 4, key=jax.random.PRNGKey(42))
    y = mod_half(x)
    jax.block_until_ready(y)
    assert y.shape == (2, 4, 8, 8)
    y_ref = _ref_conv(x, mod_half.w, mod_half.b, (2, 2), ((1, 1), (1, 1)))
    assert jnp.allclose(y, y_ref, atol=1e-4, rtol=1e-4), \
        float(jnp.max(jnp.abs(y - y_ref)))

    # 'timepreserve': depthwise (3,1), stride (2,1), padding (1,0)
    mod_tp = LearnedDownSample("timepreserve", 4, key=jax.random.PRNGKey(7))
    y_tp = mod_tp(x)
    jax.block_until_ready(y_tp)
    assert y_tp.shape == (2, 4, 8, 16)
    y_tp_ref = _ref_conv(x, mod_tp.w, mod_tp.b, (2, 1), ((1, 1), (0, 0)))
    assert jnp.allclose(y_tp, y_tp_ref, atol=1e-4, rtol=1e-4), \
        float(jnp.max(jnp.abs(y_tp - y_tp_ref)))

    # 'none': identity
    mod_none = LearnedDownSample("none", 4)
    assert jnp.array_equal(mod_none(x), x)

    print("KERNEL_OK")
</pallas_src>

<mosaic_0001>
module attributes {stable_mosaic.version = 11 : i64} {
  func.func @_dw_half_kernel(%arg0: i32, %arg1: i32, %arg2: memref<1x4x16x16xf32, #tpu.memory_space<vmem>>, %arg3: memref<1x4x10xf32, #tpu.memory_space<vmem>>, %arg4: memref<3x8x16xf32, #tpu.memory_space<vmem>>, %arg5: memref<3x16x8xf32, #tpu.memory_space<vmem>>, %arg6: memref<1x4x8x8xf32, #tpu.memory_space<vmem>>) attributes {dimension_semantics = [#tpu.dimension_semantics<parallel>, #tpu.dimension_semantics<parallel>], iteration_bounds = array<i64: 2, 1>, scalar_prefetch = 0 : i64, scratch_operands = 0 : i64, tpu.core_type = #tpu.core_type<tc>, window_params = [{transform_indices = @transform_0, window_bounds = array<i64: 1, 4, 16, 16>}, {transform_indices = @transform_1, window_bounds = array<i64: 1, 4, 10>}, {pipeline_mode = #tpu.pipeline_mode<synchronous>, transform_indices = @transform_2, window_bounds = array<i64: 3, 8, 16>}, {pipeline_mode = #tpu.pipeline_mode<synchronous>, transform_indices = @transform_3, window_bounds = array<i64: 3, 16, 8>}, {transform_indices = @transform_4, window_bounds = array<i64: 1, 4, 8, 8>}]} {
    %c0 = arith.constant 0 : index
    %c0_0 = arith.constant 0 : index
    %c0_1 = arith.constant 0 : index
    %c0_2 = arith.constant 0 : index
    %0 = vector.load %arg2[%c0, %c0_0, %c0_1, %c0_2] : memref<1x4x16x16xf32, #tpu.memory_space<vmem>>, vector<1x4x16x16xf32>
    %1 = vector.shape_cast %0 : vector<1x4x16x16xf32> to vector<4x16x16xf32>
    %c0_3 = arith.constant 0 : index
    %c0_4 = arith.constant 0 : index
    %c0_5 = arith.constant 0 : index
    %2 = vector.load %arg3[%c0_3, %c0_4, %c0_5] : memref<1x4x10xf32, #tpu.memory_space<vmem>>, vector<1x4x10xf32>
    %3 = vector.shape_cast %2 : vector<1x4x10xf32> to vector<4x10xf32>
    %c0_6 = arith.constant 0 : index
    %c0_7 = arith.constant 0 : index
    %c0_8 = arith.constant 0 : index
    %4 = vector.load %arg4[%c0_6, %c0_7, %c0_8] : memref<3x8x16xf32, #tpu.memory_space<vmem>>, vector<3x8x16xf32>
    %c0_9 = arith.constant 0 : index
    %c0_10 = arith.constant 0 : index
    %c0_11 = arith.constant 0 : index
    %5 = vector.load %arg5[%c0_9, %c0_10, %c0_11] : memref<3x16x8xf32, #tpu.memory_space<vmem>>, vector<3x16x8xf32>
    %6 = vector.shape_cast %1 : vector<4x16x16xf32> to vector<64x16xf32>
    %7 = vector.extract_strided_slice %3 {offsets = [0, 9], sizes = [4, 1], strides = [1, 1]} : vector<4x10xf32> to vector<4x1xf32>
    %8 = vector.shape_cast %7 : vector<4x1xf32> to vector<4xf32>
    %9 = vector.shape_cast %8 : vector<4xf32> to vector<4x1x1xf32>
    %10 = vector.shape_cast %9 : vector<4x1x1xf32> to vector<4x1x1xf32>
    %11 = vector.broadcast %10 : vector<4x1x1xf32> to vector<4x8x8xf32>
    %12 = vector.extract_strided_slice %5 {offsets = [0, 0, 0], sizes = [1, 16, 8], strides = [1, 1, 1]} : vector<3x16x8xf32> to vector<1x16x8xf32>
    %13 = vector.shape_cast %12 : vector<1x16x8xf32> to vector<16x8xf32>
    %cst = arith.constant dense<0.000000e+00> : vector<64x8xf32>
    %14 = tpu.matmul %6, %13, %cst {dimension_numbers = #tpu.dot_dimension_numbers<[1], [0], [0], [1], [0, 0, 1, 1], [], []>, precision = #tpu.contract_precision<fp32>} : vector<64x16xf32>, vector<16x8xf32>, vector<64x8xf32> -> vector<64x8xf32>
    %15 = vector.shape_cast %14 : vector<64x8xf32> to vector<4x16x8xf32>
    %16 = vector.extract_strided_slice %4 {offsets = [0, 0, 0], sizes = [1, 8, 16], strides = [1, 1, 1]} : vector<3x8x16xf32> to vector<1x8x16xf32>
    %17 = vector.shape_cast %16 : vector<1x8x16xf32> to vector<8x16xf32>
    %18 = vector.shape_cast %17 : vector<8x16xf32> to vector<1x8x16xf32>
    %19 = vector.extract_strided_slice %3 {offsets = [0, 0], sizes = [4, 1], strides = [1, 1]} : vector<4x10xf32> to vector<4x1xf32>
    %20 = vector.shape_cast %19 : vector<4x1xf32> to vector<4xf32>
    %21 = vector.shape_cast %20 : vector<4xf32> to vector<4x1x1xf32>
    %22 = vector.broadcast %18 : vector<1x8x16xf32> to vector<4x8x16xf32>
    %23 = vector.broadcast %21 : vector<4x1x1xf32> to vector<4x8x16xf32>
    %24 = arith.mulf %22, %23 : vector<4x8x16xf32>
    %25 = vector.extract_strided_slice %4 {offsets = [1, 0, 0], sizes = [1, 8, 16], strides = [1, 1, 1]} : vector<3x8x16xf32> to vector<1x8x16xf32>
    %26 = vector.shape_cast %25 : vector<1x8x16xf32> to vector<8x16xf32>
    %27 = vector.shape_cast %26 : vector<8x16xf32> to vector<1x8x16xf32>
    %28 = vector.extract_strided_slice %3 {offsets = [0, 3], sizes = [4, 1], strides = [1, 1]} : vector<4x10xf32> to vector<4x1xf32>
    %29 = vector.shape_cast %28 : vector<4x1xf32> to vector<4xf32>
    %30 = vector.shape_cast %29 : vector<4xf32> to vector<4x1x1xf32>
    %31 = vector.broadcast %27 : vector<1x8x16xf32> to vector<4x8x16xf32>
    %32 = vector.broadcast %30 : vector<4x1x1xf32> to vector<4x8x16xf32>
    %33 = arith.mulf %31, %32 : vector<4x8x16xf32>
    %34 = arith.addf %24, %33 : vector<4x8x16xf32>
    %35 = vector.extract_strided_slice %4 {offsets = [2, 0, 0], sizes = [1, 8, 16], strides = [1, 1, 1]} : vector<3x8x16xf32> to vector<1x8x16xf32>
    %36 = vector.shape_cast %35 : vector<1x8x16xf32> to vector<8x16xf32>
    %37 = vector.shape_cast %36 : vector<8x16xf32> to vector<1x8x16xf32>
    %38 = vector.extract_strided_slice %3 {offsets = [0, 6], sizes = [4, 1], strides = [1, 1]} : vector<4x10xf32> to vector<4x1xf32>
    %39 = vector.shape_cast %38 : vector<4x1xf32> to vector<4xf32>
    %40 = vector.shape_cast %39 : vector<4xf32> to vector<4x1x1xf32>
    %41 = vector.broadcast %37 : vector<1x8x16xf32> to vector<4x8x16xf32>
    %42 = vector.broadcast %40 : vector<4x1x1xf32> to vector<4x8x16xf32>
    %43 = arith.mulf %41, %42 : vector<4x8x16xf32>
    %44 = arith.addf %34, %43 : vector<4x8x16xf32>
    "tpu.trace_start"() <{level = 10 : i32, message = "cih,chj->cij"}> : () -> ()
    %cst_12 = arith.constant dense<0.000000e+00> : vector<4x8x8xf32>
    %45 = tpu.matmul %44, %15, %cst_12 {dimension_numbers = #tpu.dot_dimension_numbers<[2], [1], [1], [2], [0, 0, 0, 1, 1, 2], [0], [0]>, precision = #tpu.contract_precision<fp32>} : vector<4x8x16xf32>, vector<4x16x8xf32>, vector<4x8x8xf32> -> vector<4x8x8xf32>
    "tpu.trace_stop"() : () -> ()
    %46 = arith.addf %11, %45 : vector<4x8x8xf32>
    %47 = vector.extract_strided_slice %5 {offsets = [1, 0, 0], sizes = [1, 16, 8], strides = [1, 1, 1]} : vector<3x16x8xf32> to vector<1x16x8xf32>
    %48 = vector.shape_cast %47 : vector<1x16x8xf32> to vector<16x8xf32>
    %cst_13 = arith.constant dense<0.000000e+00> : vector<64x8xf32>
    %49 = tpu.matmul %6, %48, %cst_13 {dimension_numbers = #tpu.dot_dimension_numbers<[1], [0], [0], [1], [0, 0, 1, 1], [], []>, precision = #tpu.contract_precision<fp32>} : vector<64x16xf32>, vector<16x8xf32>, vector<64x8xf32> -> vector<64x8xf32>
    %50 = vector.shape_cast %49 : vector<64x8xf32> to vector<4x16x8xf32>
    %51 = vector.extract_strided_slice %4 {offsets = [0, 0, 0], sizes = [1, 8, 16], strides = [1, 1, 1]} : vector<3x8x16xf32> to vector<1x8x16xf32>
    %52 = vector.shape_cast %51 : vector<1x8x16xf32> to vector<8x16xf32>
    %53 = vector.shape_cast %52 : vector<8x16xf32> to vector<1x8x16xf32>
    %54 = vector.extract_strided_slice %3 {offsets = [0, 1], sizes = [4, 1], strides = [1, 1]} : vector<4x10xf32> to vector<4x1xf32>
    %55 = vector.shape_cast %54 : vector<4x1xf32> to vector<4xf32>
    %56 = vector.shape_cast %55 : vector<4xf32> to vector<4x1x1xf32>
    %57 = vector.broadcast %53 : vector<1x8x16xf32> to vector<4x8x16xf32>
    %58 = vector.broadcast %56 : vector<4x1x1xf32> to vector<4x8x16xf32>
    %59 = arith.mulf %57, %58 : vector<4x8x16xf32>
    %60 = vector.extract_strided_slice %4 {offsets = [1, 0, 0], sizes = [1, 8, 16], strides = [1, 1, 1]} : vector<3x8x16xf32> to vector<1x8x16xf32>
    %61 = vector.shape_cast %60 : vector<1x8x16xf32> to vector<8x16xf32>
    %62 = vector.shape_cast %61 : vector<8x16xf32> to vector<1x8x16xf32>
    %63 = vector.extract_strided_slice %3 {offsets = [0, 4], sizes = [4, 1], strides = [1, 1]} : vector<4x10xf32> to vector<4x1xf32>
    %64 = vector.shape_cast %63 : vector<4x1xf32> to vector<4xf32>
    %65 = vector.shape_cast %64 : vector<4xf32> to vector<4x1x1xf32>
    %66 = vector.broadcast %62 : vector<1x8x16xf32> to vector<4x8x16xf32>
    %67 = vector.broadcast %65 : vector<4x1x1xf32> to vector<4x8x16xf32>
    %68 = arith.mulf %66, %67 : vector<4x8x16xf32>
    %69 = arith.addf %59, %68 : vector<4x8x16xf32>
    %70 = vector.extract_strided_slice %4 {offsets = [2, 0, 0], sizes = [1, 8, 16], strides = [1, 1, 1]} : vector<3x8x16xf32> to vector<1x8x16xf32>
    %71 = vector.shape_cast %70 : vector<1x8x16xf32> to vector<8x16xf32>
    %72 = vector.shape_cast %71 : vector<8x16xf32> to vector<1x8x16xf32>
    %73 = vector.extract_strided_slice %3 {offsets = [0, 7], sizes = [4, 1], strides = [1, 1]} : vector<4x10xf32> to vector<4x1xf32>
    %74 = vector.shape_cast %73 : vector<4x1xf32> to vector<4xf32>
    %75 = vector.shape_cast %74 : vector<4xf32> to vector<4x1x1xf32>
    %76 = vector.broadcast %72 : vector<1x8x16xf32> to vector<4x8x16xf32>
    %77 = vector.broadcast %75 : vector<4x1x1xf32> to vector<4x8x16xf32>
    %78 = arith.mulf %76, %77 : vector<4x8x16xf32>
    %79 = arith.addf %69, %78 : vector<4x8x16xf32>
    "tpu.trace_start"() <{level = 10 : i32, message = "cih,chj->cij"}> : () -> ()
    %cst_14 = arith.constant dense<0.000000e+00> : vector<4x8x8xf32>
    %80 = tpu.matmul %79, %50, %cst_14 {dimension_numbers = #tpu.dot_dimension_numbers<[2], [1], [1], [2], [0, 0, 0, 1, 1, 2], [0], [0]>, precision = #tpu.contract_precision<fp32>} : vector<4x8x16xf32>, vector<4x16x8xf32>, vector<4x8x8xf32> -> vector<4x8x8xf32>
    "tpu.trace_stop"() : () -> ()
    %81 = arith.addf %46, %80 : vector<4x8x8xf32>
    %82 = vector.extract_strided_slice %5 {offsets = [2, 0, 0], sizes = [1, 16, 8], strides = [1, 1, 1]} : vector<3x16x8xf32> to vector<1x16x8xf32>
    %83 = vector.shape_cast %82 : vector<1x16x8xf32> to vector<16x8xf32>
    %cst_15 = arith.constant dense<0.000000e+00> : vector<64x8xf32>
    %84 = tpu.matmul %6, %83, %cst_15 {dimension_numbers = #tpu.dot_dimension_numbers<[1], [0], [0], [1], [0, 0, 1, 1], [], []>, precision = #tpu.contract_precision<fp32>} : vector<64x16xf32>, vector<16x8xf32>, vector<64x8xf32> -> vector<64x8xf32>
    %85 = vector.shape_cast %84 : vector<64x8xf32> to vector<4x16x8xf32>
    %86 = vector.extract_strided_slice %4 {offsets = [0, 0, 0], sizes = [1, 8, 16], strides = [1, 1, 1]} : vector<3x8x16xf32> to vector<1x8x16xf32>
    %87 = vector.shape_cast %86 : vector<1x8x16xf32> to vector<8x16xf32>
    %88 = vector.shape_cast %87 : vector<8x16xf32> to vector<1x8x16xf32>
    %89 = vector.extract_strided_slice %3 {offsets = [0, 2], sizes = [4, 1], strides = [1, 1]} : vector<4x10xf32> to vector<4x1xf32>
    %90 = vector.shape_cast %89 : vector<4x1xf32> to vector<4xf32>
    %91 = vector.shape_cast %90 : vector<4xf32> to vector<4x1x1xf32>
    %92 = vector.broadcast %88 : vector<1x8x16xf32> to vector<4x8x16xf32>
    %93 = vector.broadcast %91 : vector<4x1x1xf32> to vector<4x8x16xf32>
    %94 = arith.mulf %92, %93 : vector<4x8x16xf32>
    %95 = vector.extract_strided_slice %4 {offsets = [1, 0, 0], sizes = [1, 8, 16], strides = [1, 1, 1]} : vector<3x8x16xf32> to vector<1x8x16xf32>
    %96 = vector.shape_cast %95 : vector<1x8x16xf32> to vector<8x16xf32>
    %97 = vector.shape_cast %96 : vector<8x16xf32> to vector<1x8x16xf32>
    %98 = vector.extract_strided_slice %3 {offsets = [0, 5], sizes = [4, 1], strides = [1, 1]} : vector<4x10xf32> to vector<4x1xf32>
    %99 = vector.shape_cast %98 : vector<4x1xf32> to vector<4xf32>
    %100 = vector.shape_cast %99 : vector<4xf32> to vector<4x1x1xf32>
    %101 = vector.broadcast %97 : vector<1x8x16xf32> to vector<4x8x16xf32>
    %102 = vector.broadcast %100 : vector<4x1x1xf32> to vector<4x8x16xf32>
    %103 = arith.mulf %101, %102 : vector<4x8x16xf32>
    %104 = arith.addf %94, %103 : vector<4x8x16xf32>
    %105 = vector.extract_strided_slice %4 {offsets = [2, 0, 0], sizes = [1, 8, 16], strides = [1, 1, 1]} : vector<3x8x16xf32> to vector<1x8x16xf32>
    %106 = vector.shape_cast %105 : vector<1x8x16xf32> to vector<8x16xf32>
    %107 = vector.shape_cast %106 : vector<8x16xf32> to vector<1x8x16xf32>
    %108 = vector.extract_strided_slice %3 {offsets = [0, 8], sizes = [4, 1], strides = [1, 1]} : vector<4x10xf32> to vector<4x1xf32>
    %109 = vector.shape_cast %108 : vector<4x1xf32> to vector<4xf32>
    %110 = vector.shape_cast %109 : vector<4xf32> to vector<4x1x1xf32>
    %111 = vector.broadcast %107 : vector<1x8x16xf32> to vector<4x8x16xf32>
    %112 = vector.broadcast %110 : vector<4x1x1xf32> to vector<4x8x16xf32>
    %113 = arith.mulf %111, %112 : vector<4x8x16xf32>
    %114 = arith.addf %104, %113 : vector<4x8x16xf32>
    "tpu.trace_start"() <{level = 10 : i32, message = "cih,chj->cij"}> : () -> ()
    %cst_16 = arith.constant dense<0.000000e+00> : vector<4x8x8xf32>
    %115 = tpu.matmul %114, %85, %cst_16 {dimension_numbers = #tpu.dot_dimension_numbers<[2], [1], [1], [2], [0, 0, 0, 1, 1, 2], [0], [0]>, precision = #tpu.contract_precision<fp32>} : vector<4x8x16xf32>, vector<4x16x8xf32>, vector<4x8x8xf32> -> vector<4x8x8xf32>
    "tpu.trace_stop"() : () -> ()
    %116 = arith.addf %81, %115 : vector<4x8x8xf32>
    %c0_17 = arith.constant 0 : index
    %c0_18 = arith.constant 0 : index
    %c0_19 = arith.constant 0 : index
    %c0_20 = arith.constant 0 : index
    %117 = vector.load %arg6[%c0_17, %c0_18, %c0_19, %c0_20] : memref<1x4x8x8xf32, #tpu.memory_space<vmem>>, vector<1x4x8x8xf32>
    %118 = vector.shape_cast %117 : vector<1x4x8x8xf32> to vector<4x8x8xf32>
    %119 = vector.shape_cast %116 : vector<4x8x8xf32> to vector<1x4x8x8xf32>
    tpu.vector_store %arg6[%c0_17, %c0_18, %c0_19, %c0_20], %119 {strides = array<i32>} : memref<1x4x8x8xf32, #tpu.memory_space<vmem>>, vector<1x4x8x8xf32>,
    return
  }
  func.func @transform_0(%arg0: i32, %arg1: i32) -> (i32, i32, i32, i32) {
    %c0_i32 = arith.constant 0 : i32
    %c0_i32_0 = arith.constant 0 : i32
    %c0_i32_1 = arith.constant 0 : i32
    return %arg0, %arg1, %c0_i32, %c0_i32_0 : i32, i32, i32, i32
  }
  func.func @transform_1(%arg0: i32, %arg1: i32) -> (i32, i32, i32) {
    %c0_i32 = arith.constant 0 : i32
    %c0_i32_0 = arith.constant 0 : i32
    %c0_i32_1 = arith.constant 0 : i32
    return %arg1, %c0_i32, %c0_i32_0 : i32, i32, i32
  }
  func.func @transform_2(%arg0: i32, %arg1: i32) -> (i32, i32, i32) {
    %c0_i32 = arith.constant 0 : i32
    %c0_i32_0 = arith.constant 0 : i32
    %c0_i32_1 = arith.constant 0 : i32
    %c0_i32_2 = arith.constant 0 : i32
    return %c0_i32, %c0_i32_0, %c0_i32_1 : i32, i32, i32
  }
  func.func @transform_3(%arg0: i32, %arg1: i32) -> (i32, i32, i32) {
    %c0_i32 = arith.constant 0 : i32
    %c0_i32_0 = arith.constant 0 : i32
    %c0_i32_1 = arith.constant 0 : i32
    %c0_i32_2 = arith.constant 0 : i32
    return %c0_i32, %c0_i32_0, %c0_i32_1 : i32, i32, i32
  }
  func.func @transform_4(%arg0: i32, %arg1: i32) -> (i32, i32, i32, i32) {
    %c0_i32 = arith.constant 0 : i32
    %c0_i32_0 = arith.constant 0 : i32
    %c0_i32_1 = arith.constant 0 : i32
    return %arg0, %arg1, %c0_i32, %c0_i32_0 : i32, i32, i32, i32
  }
}

</mosaic_0001>

<bundles_post_ra>
// kernel: tpu_custom_call.1
= control target key start
LH: loop header
LB: loop body
LE: loop exit
PB: predicated region body
PF: predicated region fallthrough
CT: control target
= control target key end

     0   :  { %9 = vsyncpa [#allocation3], 0  ;;  %s5063_s0 = inlined_call_operand.hbm [shape: f32[2,4,16,16], index: 0, kind: input, shape index: {}]   ;;  %s5064_s1 = inlined_call_operand.vmem [shape: f32[1,4,10], index: 1, kind: input, shape index: {}]   ;;  %s5065_s2 = inlined_call_operand.vmem [shape: f32[3,8,16], index: 2, kind: input, shape index: {}]   ;;  %s5066_s3 = inlined_call_operand.vmem [shape: f32[3,16,8], index: 3, kind: input, shape index: {}]   ;;  %s5067_s4 = inlined_call_operand.hbm [shape: f32[2,4,8,8], index: 4, kind: output, shape index: {}]  }
   0x1   :  { %11 = vsyncpa [#allocation3 + $0x1], 0 }
   0x2   :  { %12 = vsyncpa [#allocation4], 0 }
   0x3   :  { %14 = vsyncpa [#allocation4 + $0x1], 0  ;;  %s4018_s15 = smov 0   ;;  %s4020_s16 = smov 0  }
   0x4   :  { %s4022_s17 = smov 0   ;;  %s4024_s18 = smov 0  }
   0x5   :  { %s4026_s19 = smov 0   ;;  %s4028_s20 = smov 0  }
   0x6 LB: > { %s3736_s21 = sadd.s32 4294967295, %s3977_s20   ;;  %s3737_s22 = sadd.s32 4294967294, %s3977_s20   ;;  %s3977_s20 = sphi %s4028_s20, %s20_s20   ;;  %s3973_s19 = sphi %s4026_s19, %s5212_s19   ;;  %s3969_s18 = sphi %s4024_s18, %s5211_s18   ;;  %s3965_s17 = sphi %s4022_s17, %s5210_s17   ;;  %s3961_s16 = sphi %s4020_s16, %s5209_s16   ;;  %s3957_s15 = sphi %s4018_s15, %s5208_s15  }
   0x7   : > { %s32_s23 = sadd.s32 1, %s3973_s19  ;;  %s41_s24 = sadd.s32 1, %s3965_s17 }
   0x8   : > { %p34_p0 = scmp.ge.s32.totalorder %s32_s23, 2  ;;  %p48_p1 = scmp.ne.s32.totalorder %s3965_s17, %s3961_s16 }
   0x9   : > { %p49_p2 = scmp.eq.s32.totalorder %s3977_s20, 0  ;;  %p54_p3 = scmp.ne.s32.totalorder %s3961_s16, %s3957_s15 }
   0xa   : > { %s5214_s23 = smov (%p34_p0, %s32_s23), 0  ;;  %p55_p5 = scmp.eq.s32.totalorder %s3736_s21, 0 }
   0xb   : > { %p4059_p4 = por %p49_p2, %p48_p1  ;;  %s36_s26 = ssub.s32 %s3973_s19, %s5214_s23 }
   0xc   : > { %p148_p6 = scmp.eq.s32.totalorder %s3736_s21, 1  ;;  %p39_p7 = scmp.eq.s32.totalorder %s36_s26, 0 }
   0xd   : > { %p4065_p8 = por %p55_p5, %p54_p3  ;;  %p154_p10 = scmp.eq.s32.totalorder %s3737_s22, 1 }
   0xe   : > { %p4069_p9 = por %p148_p6, %p48_p1  ;;  %p3740_p12 = scmp.ge.s32.totalorder %s3977_s20, 2 }
   0xf   : > { %s4074_s29 = scalar_select %p39_p7, %s3965_s17, %s41_s24  }
  0x10   : > { %p4076_p11 = por %p154_p10, %p54_p3  ;;  %p3766_p13 = scmp.lt.s32.totalorder %s3977_s20, 2 }
  0x11   : > { %s187_s5 = sand.u32 1, %s3965_s17   ;;  %s3752_s7 = sshll.u32 %s3973_s19, 6 }
  0x12   : > { %s3741_s6 = sshll.u32 %s187_s5, 6  ;;  %s199_s10 = scalar_lea.hbm %s5063_s0, %s3752_s7 }
  0x13   : > { %s191_s11 = scalar_lea.vmem [#allocation2], %s3741_s6  ;;  %s200_s13 = sshll.u32 %s199_s10, 4  ;;  %s201_s13 = int_to_ptr.hbm [resolvable:$true] %s200_s13 }
  0x14   : > { %s202_s12 = sshll.u32 %s191_s11, 4  ;;  %p3759_p0 = pnand %p3766_p13, %p4059_p4  ;;  %s203_s12 = int_to_ptr.vmem [resolvable:$true] %s202_s12 }
  0x15   : > { %p3744_p1 = scmp.ge.s32.totalorder %s3977_s20, 1  ;;  %s188_s14 = scalar_lea.sflag [#allocation3], %s187_s5 }
  0x16   : > { %s3979_s21 = smov 128   ;;  %s3980_s22 = smov 8  }
  0x17   : > { %3761 = dma.hbm_to_vmem [thread:$0]  (!%p3759_p0), %s201_s13, 1024, %s203_s12, %s188_s14, %s3979_s21, %s3979_s21, %s3980_s22  }
  0x18   : > { %p210_p2 = scmp.lt.s32.totalorder %s3977_s20, 3 }
  0x1a   : > { %p211_p3 = pnand %p3744_p1, %p210_p2 }
  0x1c   : > { %214 = sbr.rel (%p211_p3) target bundleno = 1011 (0x3f3), region = 36 }
  0x21   : > { %s4092_s24 = sand.u32 1, %s3961_s16  }
  0x22   : > { %s3745_s26 = sshll.u32 %s4092_s24, 6  ;;  %s217_s6 = scalar_lea.sflag [#allocation3], %s4092_s24 }
  0x23   : > { %s4096_s7 = scalar_lea.vmem [#allocation2], %s3745_s26 }
  0x24   : > { %3948 = dma.done.wait (%p4065_p8), %s217_s6, 1024  }
  0x25   : > { %3950 = vsyncadd (%p4065_p8), %s217_s6, 4294966272  ;;  %vm298_vm0 = vcmask 130048   ;;  %v269_v0 = vld [vmem:[%s5066_s3 + $0x8] sm:$0xff]  ;;  %v268_v1 = vld [vmem:[%s5066_s3] sm:$0xff]  ;;  %v3981_v61 = vmov 0   ;;  %s3746_s22 = sshll.u32 %s4092_s24, 5 }
  0x26   : > { %v256_v2 = vld [vmem:[%s4096_s7] sm:$0xff]  ;;  %v337_v3 = vand.u32 4294901760, %v269_v0  ;;  %v339_v4 = vand.u32 4294901760, %v268_v1  ;;  %v257_v6 = vld [vmem:[%s4096_s7 + $0x8] sm:$0xff]  ;;  %v258_v9 = vld [vmem:[%s4096_s7 + $0x10] sm:$0xff]  ;;  %3830 = vset.pattern.permute.xlu0 %v3981_v61  ;;  %vm3611_vm1 = vcmask 64512  }
  0x27   : > { %v300_v5 = vsel %vm298_vm0, %v256_v2, 0  ;;  %v303_v8 = vsel %vm298_vm0, %v257_v6, 0  ;;  %v306_v17 = vsel %vm298_vm0, %v258_v9, 0  ;;  %v259_v27 = vld [vmem:[%s4096_s7 + $0x18] sm:$0xff]  ;;  %v260_v34 = vld [vmem:[%s4096_s7 + $0x20] sm:$0xff]  ;;  %v261_v41 = vld [vmem:[%s4096_s7 + $0x28] sm:$0xff] }
  0x28   : > { %v4111_v7 = vand.u32 4294901760, %v300_v5  ;;  %v421_v10 = vsub.f32 %v269_v0, %v337_v3  ;;  %338 = vmatpush.msra.mxu0 %v337_v3  ;;  %v427_v11 = vsub.f32 %v268_v1, %v339_v4  ;;  %541 = vmatpush.msra.mxu3 %v337_v3  ;;  %v4115_v12 = vand.u32 4294901760, %v303_v8  ;;  %v262_v48 = vld [vmem:[%s4096_s7 + $0x30] sm:$0xff]  ;;  %v263_v55 = vld [vmem:[%s4096_s7 + $0x38] sm:$0xff]  ;;  %v264_v56 = vld [vmem:[%s5064_s1] sm:$0xf] }
  0x29   : > { %v4134_v23 = vand.u32 4294901760, %v306_v17  ;;  %v309_v30 = vsel %vm298_vm0, %v259_v27, 0  ;;  %v312_v37 = vsel %vm298_vm0, %v260_v34, 0  ;;  %v315_v44 = vsel %vm298_vm0, %v261_v41, 0  ;;  %s4993_s26 = scalar_lea.vmem [#allocation5], %s3746_s22  ;;  %s3753_s6 = sshll.u32 %s3969_s18, 5 }
  0x2a   : > { %v4118_v13 = vsub.f32 %v300_v5, %v4111_v7  ;;  %481 = vmatpush.msra.mxu2 %v421_v10  ;;  %340 = vmatpush.msra.mxu0 %v339_v4  ;;  %v422_v14 = vand.u32 4294901760, %v421_v10  ;;  %v428_v15 = vand.u32 4294901760, %v427_v11  ;;  %v4121_v16 = vsub.f32 %v303_v8, %v4115_v12  ;;  %s3630_s5 = scalar_lea.hbm %s5067_s4, %s3753_s6  ;;  %s3631_s8 = sshll.u32 %s4993_s26, 4  ;;  %s3632_s8 = int_to_ptr.vmem [resolvable:$true] %s3631_s8 }
  0x2b   : > { %543 = vmatpush.msra.mxu3 %v339_v4  ;;  %v4143_v29 = vsub.f32 %v306_v17, %v4134_v23  ;;  %v4154_v33 = vand.u32 4294901760, %v309_v30  ;;  %v4172_v40 = vand.u32 4294901760, %v312_v37  ;;  %v4190_v47 = vand.u32 4294901760, %v315_v44  ;;  %s3633_s9 = sshll.u32 %s3630_s5, 4  ;;  %s3617_s18 = scalar_lea.sflag [#allocation4], %s4092_s24  ;;  %s3634_s9 = int_to_ptr.hbm [resolvable:$true] %s3633_s9 }
  0x2c   : > { %v4125_v18 = vand.u32 4294901760, %v4118_v13  ;;  %484 = vmatpush.msra.mxu2 %v427_v11  ;;  %v423_v19 = vsub.f32 %v421_v10, %v422_v14  ;;  %v429_v20 = vsub.f32 %v427_v11, %v428_v15  ;;  %610 = vmatpush.msrb.mxu0 %v422_v14  ;;  %v4132_v22 = vand.u32 4294901760, %v4121_v16  ;;  %s3909_s27 = sshra.s32 %s3634_s9, 4  ;;  %s3915_s13 = scalar_lea.hbm %s5067_s4, 64  ;;  %s3910_s27 = int_to_ptr.hbm [resolvable:$true] %s3909_s27 }
  0x2d   : > { %487 = vmatmul.f32.vlgmr.msra.gmra.mxu2 %v4118_v13  ;;  %v4152_v32 = vand.u32 4294901760, %v4143_v29  ;;  %v4161_v36 = vsub.f32 %v309_v30, %v4154_v33  ;;  %v4179_v43 = vsub.f32 %v312_v37, %v4172_v40  ;;  %v4197_v50 = vsub.f32 %v315_v44, %v4190_v47  ;;  %s3911_s10 = scalar_lea.hbm %s3910_s27, 32  ;;  %p3916_p7 = scmp.lt.s32.totalorder %s3910_s27, %s5067_s4 }
  0x2e   : > { %v344_v21 = vsub.f32 %v4118_v13, %v4125_v18  ;;  %547 = vmatmul.f32.vlgmr.msra.gmra.mxu3 %v4125_v18  ;;  %v424_v24 = vand.u32 4294901760, %v423_v19  ;;  %v430_v25 = vand.u32 4294901760, %v429_v20  ;;  %614 = vmatpush.msrb.mxu0 %v428_v15  ;;  %v352_v28 = vsub.f32 %v4121_v16, %v4132_v22  ;;  %p3912_p4 = scmp.ne.s32.totalorder %s3910_s27, %s3911_s10  ;;  %p3917_p8 = scmp.lt.s32.totalorder %s3915_s13, %s3911_s10 }
  0x2f   : > { %5111 = vst [vmem:[#allocation8_spill] sm:$0xff] %v4152_v32  ;;  %v360_v35 = vsub.f32 %v4143_v29, %v4152_v32  ;;  %v4170_v39 = vand.u32 4294901760, %v4161_v36  ;;  %v4188_v46 = vand.u32 4294901760, %v4179_v43  ;;  %v318_v51 = vsel %vm298_vm0, %v262_v48, 0 }
  0x30   : > { %v4136_v26 = vand.u32 4294901760, %v344_v21  ;;  %425 = vmatpush.msra.mxu1 %v424_v24  ;;  %v4148_v31 = vand.u32 4294901760, %v352_v28  ;;  %5112 = vst [vmem:[#allocation9_spill] sm:$0xff] %v4161_v36  ;;  %v4206_v53 = vand.u32 4294901760, %v4197_v50  ;;  %v4208_v54 = vand.u32 4294901760, %v318_v51  ;;  %p3913_p5 = pnand %p3912_p4, %p4069_p9  ;;  %p3918_p10 = por %p3917_p8, %p3916_p7 }
  0x31   : > { %v4166_v38 = vand.u32 4294901760, %v360_v35  ;;  %5113 = vst [vmem:[#allocation10_spill] sm:$0xff] %v4170_v39  ;;  %v368_v42 = vsub.f32 %v4161_v36, %v4170_v39  ;;  %v376_v49 = vsub.f32 %v4179_v43, %v4188_v46  ;;  %v4220_v59 = vperm.slane %v264_v56, 0 }
  0x32   : > { %346 = vmatmul.f32.vlgmr.msra.gmra.mxu0 %v4136_v26  ;;  %431 = vmatpush.msra.mxu1 %v430_v25  ;;  %5114 = vst [vmem:[#allocation11_spill] sm:$0xff] %v4179_v43  ;;  %v384_v57 = vsub.f32 %v4197_v50, %v4206_v53  ;;  %v4218_v58 = vsub.f32 %v318_v51, %v4208_v54  ;;  %v321_v60 = vsel %vm298_vm0, %v263_v55, 0  ;;  %v276_v10 = vrot.slane %v264_v56, 2  ;;  %p3914_p6 = pneg %p3913_p5 }
  0x33   : > { %433 = vmatmul.f32.vlgmr.msra.gmra.mxu1 %v4111_v7  ;;  %v4184_v45 = vand.u32 4294901760, %v368_v42  ;;  %5115 = vst [vmem:[#allocation12_spill] sm:$0xff] %v4188_v46  ;;  %v4202_v52 = vand.u32 4294901760, %v376_v49  ;;  %700 = vperm.xlu0 %3830, %v4220_v59   ;;  %v4232_v0 = vand.u32 4294901760, %v321_v60  ;;  %v275_v14 = vrot.slane %v264_v56, 1 }
  0x34   : > { %663 = vmatpush.msrb.mxu1 %v337_v3  ;;  %5116 = vst [vmem:[#allocation13_spill] sm:$0xff] %v4197_v50  ;;  %v4226_v62 = vand.u32 4294901760, %v384_v57  ;;  %v4230_v63 = vand.u32 4294901760, %v4218_v58  ;;  %v3982_v3 = vmov 3   ;;  %v4259_v11 = vperm.slane %v276_v10, 0  ;;  %v4317_v57 = vld [vmem:[%s5065_s2] sm:$0xff]  ;;  %p3919_p13 = pnand %p3918_p10, %p3914_p6 }
  0x35   : > { %492 = vmatmul.f32.gmra.mxu2 %v4121_v16  ;;  %5117 = vst [vmem:[#allocation14_spill] sm:$0xff] %v4206_v53  ;;  %v4238_v2 = vsub.f32 %v321_v60, %v4232_v0  ;;  %3834 = vset.pattern.permute.xlu2 %v3982_v3  ;;  %v4265_v15 = vperm.slane %v275_v14, 0  ;;  %v277_v17 = vrot.slane %v264_v56, 3  ;;  %v3984_v35 = vmov 1   ;;  %v4322_v60 = vld [vmem:[%s5065_s2 + $0x8] sm:$0xff]  ;;  %v4333_v10 = vld [vmem:[%s5065_s2 + $0x10] sm:$0xff] }
  0x36   : > { %553 = vmatmul.f32.gmra.mxu3 %v4132_v22  ;;  %665 = vmatpush.msrb.mxu1 %v339_v4  ;;  %5118 = vst [vmem:[#allocation15_spill] sm:$0xff] %v4208_v54  ;;  %v392_v1 = vsub.f32 %v4218_v58, %v4230_v63  ;;  %v3983_v4 = vmov 6   ;;  %v3985_v44 = vmov 4   ;;  %v5068_v48 = vmov 7  }
  0x37   : > { %5119 = vst [vmem:[#allocation16_spill] sm:$0xff] %v4218_v58  ;;  %3832 = vset.pattern.permute.xlu1 %v3983_v4  ;;  %v4247_v6 = vand.u32 4294901760, %v4238_v2  ;;  %728 = vperm.xlu2 %3834, %v4259_v11   ;;  %v4275_v19 = vperm.slane %v277_v17, 0 }
  0x38   : > { %5120 = vst [vmem:[#allocation17_spill] sm:$0xff] %v4226_v62  ;;  %v4243_v5 = vand.u32 4294901760, %v392_v1  ;;  %744 = vperm.xlu1 %3832, %v4220_v59  }
  0x39   : > { %5121 = vst [vmem:[#allocation18_spill] sm:$0xff] %v4230_v63  ;;  %v400_v8 = vsub.f32 %v4238_v2, %v4247_v6 }
  0x3a   : > { %354 = vmatmul.f32.gmra.mxu0 %v4148_v31  ;;  %5122 = vst [vmem:[#allocation19_spill] sm:$0xff] %v4232_v0 }
  0x3b   : > { %437 = vmatmul.f32.gmra.mxu1 %v4115_v12  ;;  %5123 = vst [vmem:[#allocation20_spill] sm:$0xff] %v4238_v2  ;;  %3831 = vset.pattern.permute.xlu0 %v3982_v3  ;;  %v4255_v9 = vand.u32 4294901760, %v400_v8 }
  0x3c   : > { %720 = vperm.xlu0 %3831, %v4220_v59   ;;  %5124 = vst [vmem:[#allocation21_spill] sm:$0xff] %v4243_v5 }
  0x3d   : > { %497 = vmatmul.f32.gmra.mxu2 %v4143_v29  ;;  %5125 = vst [vmem:[#allocation22_spill] sm:$0xff] %v4247_v6 }
  0x3e   : > { %559 = vmatmul.f32.gmra.mxu3 %v4152_v32  ;;  %5126 = vst [vmem:[#allocation23_spill] sm:$0xff] %v4255_v9 }
  0x3f   : > { %3835 = vset.pattern.permute.xlu2 %v3983_v4 }
  0x40   : > { %3833 = vset.pattern.permute.xlu1 %v3981_v61  ;;  %752 = vperm.xlu2 %3835, %v4259_v11  }
  0x41   : > { %708 = vperm.xlu1 %3833, %v4259_v11  }
  0x42   : > { %362 = vmatmul.f32.gmra.mxu0 %v4166_v38 }
  0x43   : > { %441 = vmatmul.f32.gmra.mxu1 %v4134_v23 }
  0x44   : > { %724 = vperm.xlu0 %3831, %v4265_v15  }
  0x45   : > { %502 = vmatmul.f32.gmra.mxu2 %v4161_v36 }
  0x46   : > { %565 = vmatmul.f32.gmra.mxu3 %v4170_v39 }
  0x48   : > { %3836 = vset.pattern.permute.xlu2 %v3981_v61 }
  0x49   : > { %704 = vperm.xlu1 %3833, %v4265_v15   ;;  %712 = vperm.xlu2 %3836, %v4275_v19  }
  0x4a   : > { %370 = vmatmul.f32.gmra.mxu0 %v4184_v45 }
  0x4b   : > { %445 = vmatmul.f32.gmra.mxu1 %v4154_v33 }
  0x4c   : > { %3839 = vset.pattern.permute.xlu0 %v3983_v4 }
  0x4d   : > { %507 = vmatmul.f32.gmra.mxu2 %v4179_v43  ;;  %756 = vperm.xlu0 %3839, %v4275_v19  }
  0x4e   : > { %571 = vmatmul.f32.gmra.mxu3 %v4188_v46 }
  0x51   : > { %3837 = vset.pattern.permute.xlu1 %v3982_v3  ;;  %3838 = vset.pattern.permute.xlu2 %v3983_v4 }
  0x52   : > { %378 = vmatmul.f32.gmra.mxu0 %v4202_v52  ;;  %732 = vperm.xlu1 %3837, %v4275_v19  }
  0x53   : > { %449 = vmatmul.f32.gmra.mxu1 %v4172_v40  ;;  %748 = vperm.xlu2 %3838, %v4265_v15  }
  0x55   : > { %512 = vmatmul.f32.gmra.mxu2 %v4197_v50  ;;  %3844 = vset.pattern.permute.xlu0 %v3985_v44 }
  0x56   : > { %577 = vmatmul.f32.gmra.mxu3 %v4206_v53  ;;  %1824 = vperm.xlu0 %3844, %v4259_v11  }
  0x5a   : > { %386 = vmatmul.f32.gmra.mxu0 %v4226_v62  ;;  %3840 = vset.pattern.permute.xlu1 %v3984_v35 }
  0x5b   : > { %453 = vmatmul.f32.gmra.mxu1 %v4190_v47  ;;  %1796 = vperm.xlu1 %3840, %v4220_v59  }
  0x5c   : > { %3841 = vset.pattern.permute.xlu2 %v3985_v44 }
  0x5d   : > { %517 = vmatmul.f32.gmra.mxu2 %v4218_v58  ;;  %1816 = vperm.xlu2 %3841, %v4220_v59  }
  0x5e   : > { %583 = vmatmul.f32.gmra.mxu3 %v4230_v63  ;;  %1828 = vperm.xlu0 %3844, %v4275_v19  }
  0x62   : > { %394 = vmatmul.f32.gmra.mxu0 %v4243_v5 }
  0x63   : > { %457 = vmatmul.f32.gmra.mxu1 %v4208_v54  ;;  %3842 = vset.pattern.permute.xlu1 %v5068_v48 }
  0x64   : > { %1840 = vperm.xlu1 %3842, %v4220_v59  }
  0x65   : > { %522 = vmatmul.f32.gmra.mxu2 %v4238_v2  ;;  %3843 = vset.pattern.permute.xlu2 %v3984_v35 }
  0x66   : > { %589 = vmatmul.f32.gmra.mxu3 %v4247_v6  ;;  %1804 = vperm.xlu2 %3843, %v4259_v11  }
  0x6a   : > { %402 = vmatmul.f32.gmra.mxu0 %v4255_v9 }
  0x6b   : > { %461 = vmatmul.f32.gmra.mxu1 %v4232_v0 }
  0x6c   : > { %1848 = vperm.xlu1 %3842, %v4259_v11  }
  0x6e   : > { %1800 = vperm.xlu2 %3843, %v4265_v15  }
  0x72   : > { %616 = vmatmul.f32.vlgmr.msrb.gmra.mxu0 %v4111_v7 }
  0x73   : > { %667 = vmatmul.f32.vlgmr.msrb.gmra.mxu1 %v4111_v7 }
  0x74   : > { %3845 = vset.pattern.permute.xlu1 %v3984_v35 }
  0x75   : > { %1808 = vperm.xlu1 %3845, %v4275_v19  }
  0x76   : > { %3846 = vset.pattern.permute.xlu2 %v3985_v44 }
  0x77   : > { %1820 = vperm.xlu2 %3846, %v4265_v15  }
  0x7a   : > { %620 = vmatmul.f32.gmra.mxu0 %v4115_v12 }
  0x7b   : > { %671 = vmatmul.f32.gmra.mxu1 %v4115_v12 }
  0x82   : > { %624 = vmatmul.f32.gmra.mxu0 %v4134_v23 }
  0x83   : > { %675 = vmatmul.f32.gmra.mxu1 %v4134_v23 }
  0x8a   : > { %628 = vmatmul.f32.gmra.mxu0 %v4154_v33 }
  0x8b   : > { %679 = vmatmul.f32.gmra.mxu1 %v4154_v33 }
  0x91   : > { %v4312_v56 = vpop.permute.xlu2 %728 }
  0x92   : > { %632 = vmatmul.f32.gmra.mxu0 %v4172_v40 }
  0x93   : > { %683 = vmatmul.f32.gmra.mxu1 %v4172_v40 }
  0x9a   : > { %636 = vmatmul.f32.gmra.mxu0 %v4190_v47  ;;  %v4339_v6 = vpop.permute.xlu2 %752 }
  0x9b   : > { %687 = vmatmul.f32.gmra.mxu1 %v4190_v47 }
  0xa2   : > { %640 = vmatmul.f32.gmra.mxu0 %v4208_v54 }
  0xa3   : > { %691 = vmatmul.f32.gmra.mxu1 %v4208_v54 }
  0xa5   : > { %v701_v42 = vpop.permute.xlu0 %700 }
  0xa6   : > { %v715_v3 = vmul.f32 %v701_v42, %v4317_v57 }
  0xaa   : > { %644 = vmatmul.f32.gmra.mxu0 %v4232_v0  ;;  %v745_v14 = vpop.permute.xlu1 %744 }
  0xab   : > { %695 = vmatmul.f32.gmra.mxu1 %v4232_v0 }
  0xae   : > { %v721_v61 = vpop.permute.xlu0 %720 }
  0xaf   : > { %v347_v20 = vpop.f32.mrf.mxu0  ;;  %v735_v4 = vmul.f32 %v721_v61, %v4322_v60  ;;  %v759_v61 = vmul.f32 %v745_v14, %v4333_v10 }
  0xb0   : > { %v434_v21 = vpop.f32.mrf.mxu1  ;;  %v488_v51 = vpop.f32.mrf.mxu2 }
  0xb1   : > { %v548_v1 = vpop.f32.mrf.mxu3  ;;  %v739_v42 = vadd.f32 %v735_v4, %v715_v3  ;;  %v435_v63 = vadd.f32 %v434_v21, %v347_v20  ;;  %v4352_v20 = vpop.permute.xlu2 %712 }
  0xb3   : > { %v763_v2 = vadd.f32 %v759_v61, %v739_v42  ;;  %v4347_v50 = vpop.permute.xlu1 %708  ;;  %v489_v9 = vadd.f32 %v488_v51, %v435_v63  ;;  %v5127_v61 = vmov 7  }
  0xb4   : > { %3847 = vset.pattern.permute.xlu1 %v5127_v61  ;;  %3848 = vset.pattern.permute.xlu2 %v5127_v61 }
  0xb5   : > { %v768_v3 = vsel %vm298_vm0, %v763_v2, 0  ;;  %v549_v21 = vadd.f32 %v548_v1, %v489_v9  ;;  %1844 = vperm.xlu1 %3847, %v4265_v15   ;;  %1852 = vperm.xlu2 %3848, %v4275_v19  }
  0xb6   : > { %v4350_v14 = vand.u32 4294901760, %v768_v3  ;;  %v725_v5 = vpop.permute.xlu0 %724 }
  0xb7   : > { %v355_v24 = vpop.f32.mrf.mxu0 }
  0xb8   : > { %v438_v25 = vpop.f32.mrf.mxu1  ;;  %v493_v48 = vpop.f32.mrf.mxu2  ;;  %v4358_v63 = vsub.f32 %v768_v3, %v4350_v14 }
  0xb9   : > { %v554_v53 = vpop.f32.mrf.mxu3  ;;  %v439_v42 = vadd.f32 %v438_v25, %v355_v24  ;;  %v749_v32 = vpop.permute.xlu2 %748 }
  0xba   : > { %v5098_v24 = vand.u32 4294901760, %v4358_v63 }
  0xbb   : > { %v494_v51 = vadd.f32 %v493_v48, %v439_v42  ;;  %v705_v54 = vpop.permute.xlu1 %704 }
  0xbd   : > { %v555_v25 = vadd.f32 %v554_v53, %v494_v51  ;;  %v791_v53 = vsub.f32 %v4358_v63, %v5098_v24 }
  0xbf   : > { %v4291_v27 = vpop.f32.mrf.mxu0 }
  0xc0   : > { %v4293_v28 = vpop.f32.mrf.mxu1  ;;  %v498_v4 = vpop.f32.mrf.mxu2 }
  0xc1   : > { %v560_v39 = vpop.f32.mrf.mxu3  ;;  %v443_v9 = vadd.f32 %v4293_v28, %v4291_v27  ;;  %v5101_v27 = vmov 5  }
  0xc2   : > { %3850 = vset.pattern.permute.xlu1 %v5101_v27 }
  0xc3   : > { %v499_v48 = vadd.f32 %v498_v4, %v443_v9  ;;  %2912 = vperm.xlu1 %3850, %v4220_v59   ;;  %v792_v9 = vand.u32 4294901760, %v791_v53 }
  0xc7   : > { %v4295_v30 = vpop.f32.mrf.mxu0 }
  0xc8   : > { %v4297_v34 = vpop.f32.mrf.mxu1  ;;  %v503_v44 = vpop.f32.mrf.mxu2 }
  0xc9   : > { %v566_v61 = vpop.f32.mrf.mxu3  ;;  %v447_v4 = vadd.f32 %v4297_v34, %v4295_v30 }
  0xcf   : > { %v4300_v37 = vpop.f32.mrf.mxu0 }
  0xd0   : > { %v4302_v41 = vpop.f32.mrf.mxu1  ;;  %v508_v62 = vpop.f32.mrf.mxu2 }
  0xd1   : > { %v572_v53 = vpop.f32.mrf.mxu3 }
  0xd7   : > { %v4308_v49 = vpop.f32.mrf.mxu0 }
  0xd8   : > { %v4310_v55 = vpop.f32.mrf.mxu1 }
  0xdf   : > { %v4328_v8 = vpop.f32.mrf.mxu0 }
  0xe0   : > { %v4336_v17 = vpop.f32.mrf.mxu1 }
  0xe7   : > { %v4342_v58 = vpop.f32.mrf.mxu0 }
  0xe8   : > { %v4345_v46 = vpop.f32.mrf.mxu1 }
  0xef   : > { %v617_v35 = vpop.f32.mrf.mxu0 }
  0xf0   : > { %v618_v0 = vadd.f32 %v617_v35, %v549_v21  ;;  %v668_v2 = vpop.f32.mrf.mxu1  ;;  %v736_v21 = vmul.f32 %v725_v5, %v4322_v60  ;;  %v716_v35 = vmul.f32 %v705_v54, %v4317_v57 }
  0xf2   : > { %v669_v43 = vadd.f32 %v668_v2, %v618_v0  ;;  %v740_v54 = vadd.f32 %v736_v21, %v716_v35  ;;  %v760_v2 = vmul.f32 %v749_v32, %v4333_v10  ;;  %v504_v32 = vadd.f32 %v503_v44, %v447_v4 }
  0xf3   : > { %v451_v4 = vadd.f32 %v4302_v41, %v4300_v37 }
  0xf4   : > { %v4363_v1 = vand.u32 4294901760, %v669_v43  ;;  %v764_v36 = vadd.f32 %v760_v2, %v740_v54 }
  0xf5   : > { %v509_v37 = vadd.f32 %v508_v62, %v451_v4 }
  0xf6   : > { %v818_v5 = vsub.f32 %v669_v43, %v4363_v1  ;;  %v930_v34 = vsel %vm298_vm0, %v764_v36, 0 }
  0xf7   : > { %v621_v3 = vpop.f32.mrf.mxu0 }
  0xf8   : > { %v622_v0 = vadd.f32 %v621_v3, %v555_v25  ;;  %v672_v42 = vpop.f32.mrf.mxu1  ;;  %v561_v25 = vadd.f32 %v560_v39, %v499_v48  ;;  %v819_v24 = vand.u32 4294901760, %v818_v5  ;;  %v3989_v48 = vmov 2  }
  0xf9   : > { %3852 = vset.pattern.permute.xlu1 %v3989_v48  ;;  %3849 = vset.pattern.permute.xlu0 %v3989_v48 }
  0xfa   : > { %v673_v28 = vadd.f32 %v672_v42, %v622_v0  ;;  %v3988_v0 = vmov 8   ;;  %v820_v39 = vsub.f32 %v818_v5, %v819_v24  ;;  %2896 = vperm.xlu1 %3852, %v4265_v15   ;;  %2892 = vperm.xlu0 %3849, %v4220_v59  }
  0xfb   : > { %3851 = vset.pattern.permute.xlu2 %v3988_v0 }
  0xfc   : > { %v784_v51 = vand.u32 4294901760, %v673_v28  ;;  %2936 = vperm.xlu2 %3851, %v4220_v59   ;;  %v821_v36 = vand.u32 4294901760, %v820_v39  ;;  %v737_v39 = vmul.f32 %v4312_v56, %v4322_v60 }
  0xfe   : > { %v812_v3 = vsub.f32 %v673_v28, %v784_v51  ;;  %785 = vmatpush.msrb.mxu2 %v784_v51  ;;  %v567_v28 = vadd.f32 %v566_v61, %v504_v32  ;;  %v513_v61 = vpop.f32.mrf.mxu2  ;;  %v455_v32 = vadd.f32 %v4310_v55, %v4308_v49 }
  0xff   : > { %v625_v27 = vpop.f32.mrf.mxu0 }
 0x100   : > { %v626_v43 = vadd.f32 %v625_v27, %v561_v25  ;;  %787 = vmatpush.msrb.mxu2 %v4363_v1  ;;  %v813_v21 = vand.u32 4294901760, %v812_v3  ;;  %v676_v35 = vpop.f32.mrf.mxu1  ;;  %v4385_v27 = vand.u32 4294901760, %v930_v34 }
 0x101   : > { %793 = vmatmul.f32.vlgmr.msrb.gmra.mxu2 %v792_v9 }
 0x102   : > { %v677_v42 = vadd.f32 %v676_v35, %v626_v43  ;;  %844 = vmatpush.msra.mxu2 %v812_v3  ;;  %v814_v30 = vsub.f32 %v812_v3, %v813_v21  ;;  %v4393_v9 = vsub.f32 %v930_v34, %v4385_v27  ;;  %2900 = vperm.xlu1 %3852, %v4259_v11  }
 0x103   : > { %3854 = vset.pattern.permute.xlu0 %v3988_v0  ;;  %v717_v34 = vmul.f32 %v4347_v50, %v4317_v57 }
 0x104   : > { %847 = vmatpush.msra.mxu2 %v818_v5  ;;  %v815_v44 = vand.u32 4294901760, %v814_v30  ;;  %v4388_v54 = vand.u32 4294901760, %v677_v42  ;;  %2940 = vperm.xlu0 %3854, %v4265_v15  }
 0x106   : > { %896 = vmatpush.msrb.mxu2 %v813_v21  ;;  %816 = vmatpush.msrb.mxu3 %v815_v44  ;;  %v4398_v3 = vsub.f32 %v677_v42, %v4388_v54  ;;  %v952_v21 = vand.u32 4294901760, %v4393_v9  ;;  %v578_v42 = vpop.f32.mrf.mxu3  ;;  %v5129_v44 = vand.u32 4294901760, %v4358_v63  ;;  %v518_v50 = vpop.f32.mrf.mxu2 }
 0x107   : > { %v629_v2 = vpop.f32.mrf.mxu0 }
 0x108   : > { %900 = vmatpush.msrb.mxu2 %v819_v24  ;;  %v630_v5 = vadd.f32 %v629_v2, %v567_v28  ;;  %822 = vmatpush.msrb.mxu3 %v821_v36  ;;  %v680_v25 = vpop.f32.mrf.mxu1  ;;  %v5128_v24 = vmov 5   ;;  %v981_v62 = vand.u32 4294901760, %v4398_v3  ;;  %v761_v2 = vmul.f32 %v4339_v6, %v4333_v10 }
 0x109   : > { %824 = vmatmul.f32.vlgmr.msrb.gmra.mxu3 %v4350_v14  ;;  %850 = vmatmul.f32.vlgmr.msra.gmra.mxu2 %v4358_v63  ;;  %v741_v63 = vadd.f32 %v737_v39, %v717_v34  ;;  %v459_v6 = vadd.f32 %v4336_v17, %v4328_v8  ;;  %v757_v8 = vpop.permute.xlu0 %756 }
 0x10a   : > { %v681_v43 = vadd.f32 %v680_v25, %v630_v5  ;;  %869 = vmatpush.msra.mxu3 %v784_v51  ;;  %3853 = vset.pattern.permute.xlu2 %v5128_v24  ;;  %v982_v36 = vsub.f32 %v4398_v3, %v981_v62 }
 0x10b   : > { %2916 = vperm.xlu2 %3853, %v4265_v15   ;;  %3855 = vset.pattern.permute.xlu1 %v3988_v0  ;;  %v519_v17 = vadd.f32 %v518_v50, %v459_v6  ;;  %v3990_v6 = vmov 9  }
 0x10c   : > { %v4402_v41 = vand.u32 4294901760, %v681_v43  ;;  %871 = vmatpush.msra.mxu3 %v4363_v1  ;;  %2944 = vperm.xlu1 %3855, %v4259_v11  }
 0x10d   : > { %3857 = vset.pattern.permute.xlu0 %v5128_v24 }
 0x10e   : > { %921 = vmatpush.msrb.mxu3 %v784_v51  ;;  %v974_v35 = vsub.f32 %v681_v43, %v4402_v41  ;;  %947 = vmatpush.msra.mxu2 %v4402_v41  ;;  %v573_v51 = vadd.f32 %v572_v53, %v509_v37  ;;  %v514_v53 = vadd.f32 %v513_v61, %v455_v32  ;;  %v983_v43 = vand.u32 4294901760, %v982_v36  ;;  %v733_v32 = vpop.permute.xlu1 %732  ;;  %v270_v36 = vld [vmem:[%s5066_s3 + $0x10] sm:$0xff] }
 0x10f   : > { %v633_v30 = vpop.f32.mrf.mxu0  ;;  %2924 = vperm.xlu0 %3857, %v4275_v19   ;;  %v738_v34 = vmul.f32 %v733_v32, %v4322_v60 }
 0x110   : > { %923 = vmatpush.msrb.mxu3 %v4363_v1  ;;  %v975_v49 = vand.u32 4294901760, %v974_v35  ;;  %949 = vmatpush.msra.mxu2 %v4388_v54  ;;  %v684_v55 = vpop.f32.mrf.mxu1  ;;  %v953_v1 = vsub.f32 %v4393_v9, %v952_v21  ;;  %v634_v28 = vadd.f32 %v633_v30, %v573_v51  ;;  %v579_v25 = vadd.f32 %v578_v42, %v514_v53  ;;  %v584_v30 = vpop.f32.mrf.mxu3 }
 0x111   : > { %875 = vmatmul.f32.vlgmr.msra.gmra.mxu3 %v5129_v44  ;;  %902 = vmatmul.f32.vlgmr.msrb.gmra.mxu2 %v4350_v14  ;;  %v718_v42 = vmul.f32 %v4352_v20, %v4317_v57  ;;  %v523_v20 = vpop.f32.mrf.mxu2  ;;  %v762_v53 = vmul.f32 %v757_v8, %v4333_v10 }
 0x112   : > { %1006 = vmatpush.msrb.mxu2 %v974_v35  ;;  %v976_v56 = vsub.f32 %v974_v35, %v975_v49  ;;  %v954_v5 = vand.u32 4294901760, %v953_v1  ;;  %v685_v61 = vadd.f32 %v684_v55, %v634_v28 }
 0x113   : > { %2920 = vperm.xlu2 %3853, %v4259_v11   ;;  %v742_v1 = vadd.f32 %v738_v34, %v718_v42 }
 0x114   : > { %1009 = vmatpush.msrb.mxu2 %v4398_v3  ;;  %v977_v4 = vand.u32 4294901760, %v976_v56  ;;  %v765_v3 = vadd.f32 %v761_v2, %v741_v63  ;;  %v4440_v39 = vand.u32 4294901760, %v685_v61  ;;  %2948 = vperm.xlu1 %3855, %v4275_v19  }
 0x116   : > { %978 = vmatpush.msra.mxu3 %v977_v4  ;;  %v1092_v55 = vsel %vm298_vm0, %v765_v3, 0  ;;  %v766_v4 = vadd.f32 %v762_v53, %v742_v1 }
 0x117   : > { %v637_v37 = vpop.f32.mrf.mxu0  ;;  %v4460_v28 = vand.u32 4294901760, %v1092_v55  ;;  %3860 = vset.pattern.permute.xlu0 %v3990_v6 }
 0x118   : > { %v638_v35 = vadd.f32 %v637_v37, %v579_v25  ;;  %984 = vmatpush.msra.mxu3 %v983_v43  ;;  %v688_v51 = vpop.f32.mrf.mxu1  ;;  %v4476_v37 = vand.u32 4294901760, %v270_v36  ;;  %295 = vperm.xlu0 %3860, %v4275_v19  }
 0x119   : > { %925 = vmatmul.f32.vlgmr.msrb.gmra.mxu3 %v4350_v14  ;;  %955 = vmatmul.f32.vlgmr.msra.gmra.mxu2 %v954_v5  ;;  %v463_v14 = vadd.f32 %v4345_v46, %v4342_v58  ;;  %v585_v58 = vadd.f32 %v584_v30, %v519_v17  ;;  %v4473_v43 = vsub.f32 %v1092_v55, %v4460_v28 }
 0x11a   : > { %v689_v24 = vadd.f32 %v688_v51, %v638_v35  ;;  %1031 = vmatpush.msrb.mxu3 %v4402_v41  ;;  %1058 = vmatpush.msra.mxu2 %v975_v49  ;;  %v1142_v49 = vsub.f32 %v685_v61, %v4440_v39  ;;  %v590_v61 = vpop.f32.mrf.mxu3  ;;  %v1254_v35 = vsel %vm298_vm0, %v766_v4, 0 }
 0x11b   : > { %3856 = vset.pattern.permute.xlu2 %v3989_v48  ;;  %v524_v50 = vadd.f32 %v523_v20, %v463_v14  ;;  %v4491_v17 = vand.u32 4294901760, %v1254_v35 }
 0x11c   : > { %v4446_v44 = vand.u32 4294901760, %v689_v24  ;;  %1033 = vmatpush.msrb.mxu3 %v4388_v54  ;;  %1062 = vmatpush.msra.mxu2 %v981_v62  ;;  %v271_v62 = vld [vmem:[%s5066_s3 + $0x18] sm:$0xff]  ;;  %v1143_v25 = vand.u32 4294901760, %v1142_v49 }
 0x11d   : > { %2904 = vperm.xlu2 %3856, %v4275_v19   ;;  %v4468_v63 = vand.u32 4294901760, %v271_v62  ;;  %v591_v3 = vadd.f32 %v590_v61, %v524_v50  ;;  %3859 = vset.pattern.permute.xlu1 %v3990_v6  ;;  %v5134_v61 = vld [vmem:[#allocation21_spill] sm:$0xff] }
 0x11e   : > { %v1136_v48 = vsub.f32 %v689_v24, %v4446_v44  ;;  %1245 = vmatpush.msra.mxu1 %v4446_v44  ;;  %v1144_v51 = vsub.f32 %v1142_v49, %v1143_v25  ;;  %v4487_v24 = vsub.f32 %v270_v36, %v4476_v37  ;;  %287 = vperm.xlu1 %3859, %v4265_v15  }
 0x11f   : > { %v641_v46 = vpop.f32.mrf.mxu0 }
 0x120   : > { %1247 = vmatpush.msra.mxu1 %v4440_v39  ;;  %v1137_v56 = vand.u32 4294901760, %v1136_v48  ;;  %v692_v2 = vpop.f32.mrf.mxu1  ;;  %v642_v5 = vadd.f32 %v641_v46, %v585_v58  ;;  %v1524_v53 = vand.u32 4294901760, %v4487_v24  ;;  %3861 = vset.pattern.permute.xlu0 %v3988_v0 }
 0x121   : > { %986 = vmatmul.f32.vlgmr.msra.gmra.mxu3 %v4385_v27  ;;  %1012 = vmatmul.f32.vlgmr.msrb.gmra.mxu2 %v4393_v9  ;;  %v1275_v9 = vsub.f32 %v1254_v35, %v4491_v17  ;;  %v5141_v35 = vld [vmem:[#allocation16_spill] sm:$0xff] }
 0x122   : > { %1083 = vmatpush.msra.mxu3 %v4402_v41  ;;  %1109 = vmatpush.msrb.mxu2 %v4446_v44  ;;  %v1138_v32 = vsub.f32 %v1136_v48, %v1137_v56  ;;  %v4481_v41 = vsub.f32 %v271_v62, %v4468_v63  ;;  %v693_v30 = vadd.f32 %v692_v2, %v642_v5  ;;  %v5132_v5 = vld [vmem:[#allocation8_spill] sm:$0xff] }
 0x123   : > { %1249 = vmatmul.f32.vlgmr.msra.gmra.mxu1 %v4460_v28  ;;  %1220 = vmatpush.msra.mxu0 %v1137_v56  ;;  %v1525_v56 = vsub.f32 %v4487_v24, %v1524_v53  ;;  %v1276_v19 = vand.u32 4294901760, %v1275_v9 }
 0x124   : > { %1085 = vmatpush.msra.mxu3 %v4388_v54  ;;  %1111 = vmatpush.msrb.mxu2 %v4440_v39  ;;  %v1114_v54 = vand.u32 4294901760, %v4473_v43  ;;  %v1139_v8 = vand.u32 4294901760, %v1138_v32  ;;  %v1518_v14 = vand.u32 4294901760, %v4481_v41  ;;  %v1272_v20 = vand.u32 4294901760, %v693_v30  ;;  %v5137_v32 = vld [vmem:[#allocation19_spill] sm:$0xff] }
 0x125   : > { %1224 = vmatpush.msra.mxu0 %v1143_v25  ;;  %3858 = vset.pattern.permute.xlu2 %v3990_v6  ;;  %v1526_v2 = vand.u32 4294901760, %v1525_v56  ;;  %v5133_v25 = vld [vmem:[#allocation15_spill] sm:$0xff]  ;;  %v5139_v6 = vld [vmem:[#allocation13_spill] sm:$0xff] }
 0x126   : > { %1226 = vmatmul.f32.vlgmr.msra.gmra.mxu0 %v4460_v28  ;;  %283 = vperm.xlu2 %3858, %v4220_v59   ;;  %v1145_v59 = vand.u32 4294901760, %v1144_v51  ;;  %v1115_v15 = vsub.f32 %v4473_v43, %v1114_v54  ;;  %v1304_v46 = vsub.f32 %v693_v30, %v1272_v20  ;;  %v5142_v30 = vld [vmem:[#allocation14_spill] sm:$0xff] }
 0x127   : > { %v645_v42 = vpop.f32.mrf.mxu0 }
 0x128   : > { %v646_v34 = vadd.f32 %v645_v42, %v591_v3  ;;  %v696_v55 = vpop.f32.mrf.mxu1  ;;  %v1305_v50 = vand.u32 4294901760, %v1304_v46  ;;  %v5140_v3 = vld [vmem:[#allocation12_spill] sm:$0xff] }
 0x129   : > { %1037 = vmatmul.f32.vlgmr.msrb.gmra.mxu3 %v952_v21  ;;  %1064 = vmatmul.f32.vlgmr.msra.gmra.mxu2 %v4385_v27  ;;  %v1519_v21 = vsub.f32 %v4481_v41, %v1518_v14  ;;  %v5144_v42 = vld [vmem:[#allocation20_spill] sm:$0xff] }
 0x12a   : > { %v697_v1 = vadd.f32 %v696_v55, %v646_v34  ;;  %1140 = vmatpush.msrb.mxu3 %v1139_v8  ;;  %1168 = vmatpush.msra.mxu2 %v1136_v48  ;;  %v1116_v48 = vand.u32 4294901760, %v1115_v15  ;;  %v5148_v8 = vld [vmem:[#allocation22_spill] sm:$0xff] }
 0x12c   : > { %v1270_v62 = vand.u32 4294901760, %v697_v1  ;;  %1146 = vmatpush.msrb.mxu3 %v1145_v59  ;;  %1171 = vmatpush.msra.mxu2 %v1142_v49  ;;  %v1520_v49 = vand.u32 4294901760, %v1519_v21 }
 0x12e   : > { %v1298_v58 = vsub.f32 %v697_v1, %v1270_v62  ;;  %1355 = vmatpush.msrb.mxu1 %v1270_v62  ;;  %291 = vperm.xlu2 %3858, %v4259_v11   ;;  %v1306_v11 = vsub.f32 %v1304_v46, %v1305_v50 }
 0x130   : > { %v1299_v36 = vand.u32 4294901760, %v1298_v58  ;;  %1330 = vmatpush.msrb.mxu0 %v1298_v58  ;;  %1357 = vmatpush.msrb.mxu1 %v1272_v20 }
 0x131   : > { %1087 = vmatmul.f32.vlgmr.msra.gmra.mxu3 %v4385_v27  ;;  %1117 = vmatmul.f32.vlgmr.msrb.gmra.mxu2 %v1116_v48 }
 0x132   : > { %1193 = vmatpush.msra.mxu3 %v4446_v44  ;;  %1271 = vmatpush.msrb.mxu2 %v1270_v62  ;;  %v1300_v4 = vsub.f32 %v1298_v58, %v1299_v36  ;;  %v1277_v44 = vsub.f32 %v1275_v9, %v1276_v19 }
 0x133   : > { %1361 = vmatmul.f32.vlgmr.msrb.gmra.mxu1 %v1276_v19  ;;  %1333 = vmatpush.msrb.mxu0 %v1304_v46 }
 0x134   : > { %1195 = vmatpush.msra.mxu3 %v4440_v39  ;;  %1273 = vmatpush.msrb.mxu2 %v1272_v20  ;;  %v1301_v27 = vand.u32 4294901760, %v1300_v4  ;;  %v1307_v39 = vand.u32 4294901760, %v1306_v11  ;;  %v1278_v0 = vand.u32 4294901760, %v1277_v44 }
 0x135   : > { %1336 = vmatmul.f32.vlgmr.msrb.gmra.mxu0 %v1275_v9  ;;  %1521 = vmatpush.msra.mxu1 %v1520_v49 }
 0x136   : > { %1434 = vmatpush.msra.mxu0 %v4468_v63 }
 0x137   : > { %1527 = vmatpush.msra.mxu1 %v1526_v2 }
 0x138   : > { %1436 = vmatpush.msra.mxu0 %v4476_v37 }
 0x139   : > { %1759 = vmatpush.msrb.mxu1 %v4468_v63  ;;  %1148 = vmatmul.f32.vlgmr.msrb.gmra.mxu3 %v4460_v28  ;;  %v5130_v28 = vld [vmem:[#allocation17_spill] sm:$0xff] }
 0x13a   : > { %1174 = vmatmul.f32.vlgmr.msra.gmra.mxu2 %v4473_v43  ;;  %1302 = vmatpush.msrb.mxu3 %v1301_v27  ;;  %v5135_v43 = vld [vmem:[#allocation11_spill] sm:$0xff] }
 0x13b   : > { %1382 = vmatpush.msra.mxu2 %v1299_v36  ;;  %1529 = vmatmul.f32.vlgmr.msra.gmra.mxu1 %v4111_v7 }
 0x13c   : > { %1706 = vmatpush.msrb.mxu0 %v1518_v14  ;;  %1308 = vmatpush.msrb.mxu3 %v1307_v39 }
 0x13d   : > { %1386 = vmatpush.msra.mxu2 %v1305_v50  ;;  %1442 = vmatmul.f32.vlgmr.msra.gmra.mxu0 %v4136_v26 }
 0x13e   : > { %1761 = vmatpush.msrb.mxu1 %v4476_v37  ;;  %1710 = vmatpush.msrb.mxu0 %v1524_v53 }
 0x141   : > { %1199 = vmatmul.f32.vlgmr.msra.gmra.mxu3 %v1114_v54  ;;  %v5145_v54 = vld [vmem:[#allocation18_spill] sm:$0xff] }
 0x142   : > { %1279 = vmatmul.f32.vlgmr.msrb.gmra.mxu2 %v1278_v0  ;;  %1407 = vmatpush.msra.mxu3 %v1270_v62 }
 0x143   : > { %1577 = vmatpush.msrb.mxu2 %v4481_v41  ;;  %1533 = vmatmul.f32.gmra.mxu1 %v4115_v12  ;;  %v5138_v41 = vld [vmem:[#allocation23_spill] sm:$0xff] }
 0x144   : > { %1409 = vmatpush.msra.mxu3 %v1272_v20 }
 0x145   : > { %1580 = vmatpush.msrb.mxu2 %v4487_v24  ;;  %1450 = vmatmul.f32.gmra.mxu0 %v4148_v31 }
 0x149   : > { %1310 = vmatmul.f32.vlgmr.msrb.gmra.mxu3 %v4491_v17 }
 0x14a   : > { %1388 = vmatmul.f32.vlgmr.msra.gmra.mxu2 %v4491_v17  ;;  %1637 = vmatpush.msrb.mxu3 %v4468_v63  ;;  %v5131_v63 = vld [vmem:[#allocation9_spill] sm:$0xff] }
 0x14b   : > { %1537 = vmatmul.f32.gmra.mxu1 %v4134_v23 }
 0x14c   : > { %1639 = vmatpush.msrb.mxu3 %v4476_v37  ;;  %v5136_v37 = vld [vmem:[#allocation10_spill] sm:$0xff] }
 0x14d   : > { %1458 = vmatmul.f32.gmra.mxu0 %v4166_v38 }
 0x151   : > { %1411 = vmatmul.f32.vlgmr.msra.gmra.mxu3 %v4491_v17 }
 0x152   : > { %1583 = vmatmul.f32.vlgmr.msrb.gmra.mxu2 %v4118_v13 }
 0x153   : > { %1541 = vmatmul.f32.gmra.mxu1 %v4154_v33 }
 0x155   : > { %1466 = vmatmul.f32.gmra.mxu0 %v4184_v45 }
 0x159   : > { %1643 = vmatmul.f32.vlgmr.msrb.gmra.mxu3 %v4125_v18 }
 0x15a   : > { %1588 = vmatmul.f32.gmra.mxu2 %v4121_v16 }
 0x15b   : > { %1545 = vmatmul.f32.gmra.mxu1 %v4172_v40 }
 0x15d   : > { %1474 = vmatmul.f32.gmra.mxu0 %v4202_v52 }
 0x161   : > { %1649 = vmatmul.f32.gmra.mxu3 %v4132_v22 }
 0x162   : > { %1593 = vmatmul.f32.gmra.mxu2 %v4143_v29 }
 0x163   : > { %1549 = vmatmul.f32.gmra.mxu1 %v4190_v47 }
 0x165   : > { %1482 = vmatmul.f32.gmra.mxu0 %v5130_v28 }
 0x169   : > { %1655 = vmatmul.f32.gmra.mxu3 %v5132_v5 }
 0x16a   : > { %1598 = vmatmul.f32.gmra.mxu2 %v5131_v63 }
 0x16b   : > { %1553 = vmatmul.f32.gmra.mxu1 %v5133_v25 }
 0x16d   : > { %1490 = vmatmul.f32.gmra.mxu0 %v5134_v61 }
 0x171   : > { %1661 = vmatmul.f32.gmra.mxu3 %v5136_v37 }
 0x172   : > { %1603 = vmatmul.f32.gmra.mxu2 %v5135_v43 }
 0x173   : > { %1557 = vmatmul.f32.gmra.mxu1 %v5137_v32 }
 0x175   : > { %1498 = vmatmul.f32.gmra.mxu0 %v5138_v41 }
 0x179   : > { %1667 = vmatmul.f32.gmra.mxu3 %v5140_v3 }
 0x17a   : > { %1608 = vmatmul.f32.gmra.mxu2 %v5139_v6 }
 0x17b   : > { %1763 = vmatmul.f32.vlgmr.msrb.gmra.mxu1 %v4111_v7 }
 0x17d   : > { %1712 = vmatmul.f32.vlgmr.msrb.gmra.mxu0 %v4111_v7 }
 0x181   : > { %1673 = vmatmul.f32.gmra.mxu3 %v5142_v30 }
 0x182   : > { %1613 = vmatmul.f32.gmra.mxu2 %v5141_v35 }
 0x183   : > { %1767 = vmatmul.f32.gmra.mxu1 %v4115_v12 }
 0x184   : > { %v4557_v51 = vpop.f32.mrf.mxu2 }
 0x185   : > { %5143 = vst [vmem:[#allocation17_spill] sm:$0xff] %v4557_v51  ;;  %1716 = vmatmul.f32.gmra.mxu0 %v4115_v12 }
 0x189   : > { %1679 = vmatmul.f32.gmra.mxu3 %v5145_v54 }
 0x18a   : > { %1618 = vmatmul.f32.gmra.mxu2 %v5144_v42 }
 0x18b   : > { %1771 = vmatmul.f32.gmra.mxu1 %v4134_v23 }
 0x18c   : > { %v4563_v24 = vpop.f32.mrf.mxu3  ;;  %v4565_v34 = vpop.f32.mrf.mxu2 }
 0x18d   : > { %5146 = vst [vmem:[#allocation9_spill] sm:$0xff] %v4563_v24  ;;  %1720 = vmatmul.f32.gmra.mxu0 %v4134_v23 }
 0x18e   : > { %5147 = vst [vmem:[#allocation24_spill] sm:$0xff] %v4565_v34 }
 0x191   : > { %1685 = vmatmul.f32.gmra.mxu3 %v5148_v8 }
 0x193   : > { %1775 = vmatmul.f32.gmra.mxu1 %v4154_v33 }
 0x194   : > { %v4570_v17 = vpop.f32.mrf.mxu3  ;;  %v4573_v55 = vpop.f32.mrf.mxu2 }
 0x195   : > { %5149 = vst [vmem:[#allocation25_spill] sm:$0xff] %v4570_v17  ;;  %1724 = vmatmul.f32.gmra.mxu0 %v4154_v33 }
 0x196   : > { %5150 = vst [vmem:[#allocation26_spill] sm:$0xff] %v4573_v55 }
 0x19b   : > { %1779 = vmatmul.f32.gmra.mxu1 %v4172_v40 }
 0x19c   : > { %v4576_v14 = vpop.f32.mrf.mxu3  ;;  %v4579_v20 = vpop.f32.mrf.mxu2 }
 0x19d   : > { %5151 = vst [vmem:[#allocation27_spill] sm:$0xff] %v4576_v14  ;;  %1728 = vmatmul.f32.gmra.mxu0 %v4172_v40 }
 0x19e   : > { %5152 = vst [vmem:[#allocation28_spill] sm:$0xff] %v4579_v20 }
 0x1a0   : > { %v4585_v59 = vpop.f32.mrf.mxu1 }
 0x1a1   : > { %5154 = vst [vmem:[#allocation30_spill] sm:$0xff] %v4585_v59 }
 0x1a3   : > { %1783 = vmatmul.f32.gmra.mxu1 %v4190_v47  ;;  %v4587_v15 = vpop.f32.mrf.mxu0 }
 0x1a4   : > { %v4582_v1 = vpop.f32.mrf.mxu3  ;;  %5155 = vst [vmem:[#allocation31_spill] sm:$0xff] %v4587_v15  ;;  %v4589_v53 = vpop.f32.mrf.mxu2 }
 0x1a5   : > { %5153 = vst [vmem:[#allocation29_spill] sm:$0xff] %v4582_v1  ;;  %1732 = vmatmul.f32.gmra.mxu0 %v4190_v47  ;;  %v1797_v15 = vpop.permute.xlu1 %1796 }
 0x1a6   : > { %5156 = vst [vmem:[#allocation32_spill] sm:$0xff] %v4589_v53  ;;  %v1811_v1 = vmul.f32 %v1797_v15, %v4317_v57 }
 0x1ab   : > { %1787 = vmatmul.f32.gmra.mxu1 %v5133_v25 }
 0x1ac   : > { %v4592_v62 = vpop.f32.mrf.mxu3  ;;  %v4600_v46 = vpop.f32.mrf.mxu2 }
 0x1ad   : > { %5157 = vst [vmem:[#allocation33_spill] sm:$0xff] %v4592_v62  ;;  %1736 = vmatmul.f32.gmra.mxu0 %v5133_v25 }
 0x1ae   : > { %5160 = vst [vmem:[#allocation36_spill] sm:$0xff] %v4600_v46  ;;  %v1841_v46 = vpop.permute.xlu1 %1840 }
 0x1b0   : > { %v4595_v9 = vpop.f32.mrf.mxu1 }
 0x1b1   : > { %5158 = vst [vmem:[#allocation34_spill] sm:$0xff] %v4595_v9 }
 0x1b2   : > { %v4597_v21 = vpop.f32.mrf.mxu0 }
 0x1b3   : > { %5159 = vst [vmem:[#allocation35_spill] sm:$0xff] %v4597_v21  ;;  %1791 = vmatmul.f32.gmra.mxu1 %v5137_v32 }
 0x1b4   : > { %v4603_v58 = vpop.f32.mrf.mxu3  ;;  %v4605_v36 = vpop.f32.mrf.mxu2 }
 0x1b5   : > { %1740 = vmatmul.f32.gmra.mxu0 %v5137_v32  ;;  %5161 = vst [vmem:[#allocation37_spill] sm:$0xff] %v4603_v58 }
 0x1b6   : > { %5162 = vst [vmem:[#allocation38_spill] sm:$0xff] %v4605_v36  ;;  %v4642_v55 = vpop.permute.xlu1 %1848 }
 0x1b8   : > { %v1530_v48 = vpop.f32.mrf.mxu1 }
 0x1ba   : > { %v1443_v56 = vpop.f32.mrf.mxu0 }
 0x1bb   : > { %v1531_v15 = vadd.f32 %v1530_v48, %v1443_v56 }
 0x1bc   : > { %v4607_v19 = vpop.f32.mrf.mxu3 }
 0x1bd   : > { %5163 = vst [vmem:[#allocation39_spill] sm:$0xff] %v4607_v19  ;;  %v4609_v2 = vpop.f32.mrf.mxu2 }
 0x1be   : > { %5164 = vst [vmem:[#allocation40_spill] sm:$0xff] %v4609_v2 }
 0x1c0   : > { %v1534_v49 = vpop.f32.mrf.mxu1 }
 0x1c2   : > { %v1451_v50 = vpop.f32.mrf.mxu0 }
 0x1c4   : > { %v4611_v11 = vpop.f32.mrf.mxu3 }
 0x1c5   : > { %5165 = vst [vmem:[#allocation41_spill] sm:$0xff] %v4611_v11  ;;  %v4615_v44 = vpop.f32.mrf.mxu2  ;;  %v1817_v11 = vpop.permute.xlu2 %1816 }
 0x1c6   : > { %5166 = vst [vmem:[#allocation42_spill] sm:$0xff] %v4615_v44 }
 0x1c8   : > { %v1538_v4 = vpop.f32.mrf.mxu1 }
 0x1ca   : > { %v1459_v27 = vpop.f32.mrf.mxu0 }
 0x1cc   : > { %v4619_v9 = vpop.f32.mrf.mxu3 }
 0x1cd   : > { %5167 = vst [vmem:[#allocation43_spill] sm:$0xff] %v4619_v9  ;;  %v4625_v19 = vpop.f32.mrf.mxu2  ;;  %v1831_v9 = vmul.f32 %v1817_v11, %v4322_v60  ;;  %v4639_v14 = vpop.permute.xlu2 %1804 }
 0x1ce   : > { %5168 = vst [vmem:[#allocation44_spill] sm:$0xff] %v4625_v19 }
 0x1cf   : > { %v1835_v19 = vadd.f32 %v1831_v9, %v1811_v1  ;;  %v4651_v1 = vpop.permute.xlu1 %1808 }
 0x1d0   : > { %v4613_v39 = vpop.f32.mrf.mxu1 }
 0x1d2   : > { %v4617_v0 = vpop.f32.mrf.mxu0 }
 0x1d4   : > { %v4627_v2 = vpop.f32.mrf.mxu3 }
 0x1d5   : > { %5169 = vst [vmem:[#allocation45_spill] sm:$0xff] %v4627_v2  ;;  %v1584_v44 = vpop.f32.mrf.mxu2  ;;  %v1855_v2 = vmul.f32 %v1841_v46, %v4333_v10  ;;  %v1801_v54 = vpop.permute.xlu2 %1800 }
 0x1d6   : > { %v1585_v42 = vadd.f32 %v1584_v44, %v1531_v15 }
 0x1d7   : > { %v1859_v24 = vadd.f32 %v1855_v2, %v1835_v19  ;;  %v1535_v2 = vadd.f32 %v1534_v49, %v1451_v50 }
 0x1d8   : > { %v4621_v21 = vpop.f32.mrf.mxu1 }
 0x1d9   : > { %v1864_v11 = vsel %vm298_vm0, %v1859_v24, 0  ;;  %v1812_v24 = vmul.f32 %v1801_v54, %v4317_v57  ;;  %v1539_v54 = vadd.f32 %v1538_v4, %v1459_v27 }
 0x1da   : > { %v4623_v59 = vpop.f32.mrf.mxu0  ;;  %v4649_v30 = vand.u32 4294901760, %v1864_v11 }
 0x1dc   : > { %v1644_v62 = vpop.f32.mrf.mxu3  ;;  %v4654_v41 = vsub.f32 %v1864_v11, %v4649_v30 }
 0x1dd   : > { %v1589_v17 = vpop.f32.mrf.mxu2  ;;  %v1645_v9 = vadd.f32 %v1644_v62, %v1585_v42  ;;  %v1821_v37 = vpop.permute.xlu2 %1820 }
 0x1de   : > { %v1590_v43 = vadd.f32 %v1589_v17, %v1535_v2  ;;  %v1832_v48 = vmul.f32 %v1821_v37, %v4322_v60  ;;  %v1886_v56 = vand.u32 4294901760, %v4654_v41 }
 0x1e0   : > { %v4629_v36 = vpop.f32.mrf.mxu1  ;;  %v1836_v11 = vadd.f32 %v1832_v48, %v1812_v24 }
 0x1e2   : > { %v4631_v58 = vpop.f32.mrf.mxu0 }
 0x1e4   : > { %v1650_v51 = vpop.f32.mrf.mxu3 }
 0x1e5   : > { %v1594_v46 = vpop.f32.mrf.mxu2  ;;  %v1651_v15 = vadd.f32 %v1650_v51, %v1590_v43 }
 0x1e6   : > { %v1595_v2 = vadd.f32 %v1594_v46, %v1539_v54 }
 0x1e8   : > { %v4633_v53 = vpop.f32.mrf.mxu1 }
 0x1ea   : > { %v4637_v20 = vpop.f32.mrf.mxu0 }
 0x1ec   : > { %v1656_v19 = vpop.f32.mrf.mxu3 }
 0x1ed   : > { %v1599_v17 = vpop.f32.mrf.mxu2  ;;  %v1657_v5 = vadd.f32 %v1656_v19, %v1595_v2 }
 0x1f0   : > { %v4644_v34 = vpop.f32.mrf.mxu1 }
 0x1f2   : > { %v4646_v8 = vpop.f32.mrf.mxu0 }
 0x1f4   : > { %v1662_v50 = vpop.f32.mrf.mxu3 }
 0x1f8   : > { %v1764_v35 = vpop.f32.mrf.mxu1 }
 0x1fa   : > { %v1713_v3 = vpop.f32.mrf.mxu0 }
 0x1fb   : > { %v1714_v6 = vadd.f32 %v1713_v3, %v1645_v9  ;;  %v1845_v3 = vpop.permute.xlu1 %1844 }
 0x1fd   : > { %v1765_v32 = vadd.f32 %v1764_v35, %v1714_v6  ;;  %v1887_v6 = vsub.f32 %v4654_v41, %v1886_v56  ;;  %v1856_v35 = vmul.f32 %v1845_v3, %v4333_v10 }
 0x1ff   : > { %v4659_v42 = vand.u32 4294901760, %v1765_v32  ;;  %v1888_v51 = vand.u32 4294901760, %v1887_v6  ;;  %v1860_v61 = vadd.f32 %v1856_v35, %v1836_v11 }
 0x200   : > { %v1768_v44 = vpop.f32.mrf.mxu1 }
 0x201   : > { %v1914_v37 = vsub.f32 %v1765_v32, %v4659_v42  ;;  %v2026_v4 = vsel %vm298_vm0, %v1860_v61, 0  ;;  %v1543_v32 = vadd.f32 %v4613_v39, %v4617_v0 }
 0x202   : > { %v1717_v62 = vpop.f32.mrf.mxu0  ;;  %v4670_v6 = vand.u32 4294901760, %v2026_v4 }
 0x203   : > { %v1718_v9 = vadd.f32 %v1717_v62, %v1651_v15  ;;  %v1915_v24 = vand.u32 4294901760, %v1914_v37  ;;  %v1600_v19 = vadd.f32 %v1599_v17, %v1543_v32 }
 0x204   : > { %v4675_v0 = vsub.f32 %v2026_v4, %v4670_v6 }
 0x205   : > { %v1769_v49 = vadd.f32 %v1768_v44, %v1718_v9  ;;  %v1916_v44 = vsub.f32 %v1914_v37, %v1915_v24  ;;  %v1604_v9 = vpop.f32.mrf.mxu2  ;;  %v1663_v54 = vadd.f32 %v1662_v50, %v1600_v19  ;;  %v1547_v50 = vadd.f32 %v4621_v21, %v4623_v59 }
 0x206   : > { %v1813_v21 = vmul.f32 %v4639_v14, %v4317_v57  ;;  %v1857_v14 = vmul.f32 %v4642_v55, %v4333_v10  ;;  %v4712_v10 = vld [vmem:[%s5065_s2] sm:$0xff] }
 0x207   : > { %v1880_v43 = vand.u32 4294901760, %v1769_v49  ;;  %v1917_v61 = vand.u32 4294901760, %v1916_v44  ;;  %v1814_v55 = vmul.f32 %v4712_v10, %v4651_v1 }
 0x208   : > { %v1772_v25 = vpop.f32.mrf.mxu1 }
 0x209   : > { %v1908_v15 = vsub.f32 %v1769_v49, %v1880_v43  ;;  %1881 = vmatpush.msra.mxu2 %v1880_v43 }
 0x20a   : > { %v1721_v48 = vpop.f32.mrf.mxu0 }
 0x20b   : > { %v1722_v62 = vadd.f32 %v1721_v48, %v1657_v5  ;;  %1883 = vmatpush.msra.mxu2 %v4659_v42  ;;  %v1909_v3 = vand.u32 4294901760, %v1908_v15  ;;  %v1668_v5 = vpop.f32.mrf.mxu3  ;;  %v1825_v48 = vpop.permute.xlu0 %1824 }
 0x20c   : > { %1889 = vmatmul.f32.vlgmr.msra.gmra.mxu2 %v1888_v51  ;;  %v2048_v51 = vand.u32 4294901760, %v4675_v0 }
 0x20d   : > { %v1773_v27 = vadd.f32 %v1772_v25, %v1722_v62  ;;  %1940 = vmatpush.msrb.mxu2 %v1908_v15  ;;  %v1910_v46 = vsub.f32 %v1908_v15, %v1909_v3  ;;  %v1609_v15 = vpop.f32.mrf.mxu2  ;;  %v1605_v62 = vadd.f32 %v1604_v9, %v1547_v50 }
 0x20e   : > { %v2049_v44 = vsub.f32 %v4675_v0, %v2048_v51 }
 0x20f   : > { %1943 = vmatpush.msrb.mxu2 %v1914_v37  ;;  %v1911_v11 = vand.u32 4294901760, %v1910_v46  ;;  %v4672_v49 = vand.u32 4294901760, %v1773_v27  ;;  %v1669_v46 = vadd.f32 %v1668_v5, %v1605_v62 }
 0x210   : > { %v1776_v35 = vpop.f32.mrf.mxu1 }
 0x211   : > { %1992 = vmatpush.msra.mxu2 %v1909_v3  ;;  %1912 = vmatpush.msra.mxu3 %v1911_v11  ;;  %v4680_v17 = vsub.f32 %v1773_v27, %v4672_v49  ;;  %v1833_v27 = vmul.f32 %v1825_v48, %v4322_v60 }
 0x212   : > { %v1725_v39 = vpop.f32.mrf.mxu0 }
 0x213   : > { %1996 = vmatpush.msra.mxu2 %v1915_v24  ;;  %v1726_v25 = vadd.f32 %v1725_v39, %v1663_v54  ;;  %1918 = vmatpush.msra.mxu3 %v1917_v61  ;;  %v2077_v4 = vand.u32 4294901760, %v4680_v17  ;;  %v1674_v32 = vpop.f32.mrf.mxu3  ;;  %v1837_v19 = vadd.f32 %v1833_v27, %v1813_v21 }
 0x214   : > { %1920 = vmatmul.f32.vlgmr.msra.gmra.mxu3 %v4649_v30  ;;  %1946 = vmatmul.f32.vlgmr.msrb.gmra.mxu2 %v4654_v41  ;;  %v2050_v41 = vand.u32 4294901760, %v2049_v44 }
 0x215   : > { %v1777_v37 = vadd.f32 %v1776_v35, %v1726_v25  ;;  %1965 = vmatpush.msrb.mxu3 %v1880_v43  ;;  %v2078_v60 = vsub.f32 %v4680_v17, %v2077_v4  ;;  %v1861_v39 = vadd.f32 %v1857_v14, %v1837_v19 }
 0x217   : > { %v4684_v2 = vand.u32 4294901760, %v1777_v37  ;;  %1967 = vmatpush.msrb.mxu3 %v4659_v42  ;;  %v2079_v61 = vand.u32 4294901760, %v2078_v60  ;;  %v2188_v62 = vsel %vm298_vm0, %v1861_v39, 0 }
 0x218   : > { %v1780_v24 = vpop.f32.mrf.mxu1 }
 0x219   : > { %2017 = vmatpush.msra.mxu3 %v1880_v43  ;;  %v2070_v3 = vsub.f32 %v1777_v37, %v4684_v2  ;;  %2043 = vmatpush.msrb.mxu2 %v4684_v2  ;;  %v1829_v37 = vpop.permute.xlu0 %1828 }
 0x21a   : > { %v1729_v59 = vpop.f32.mrf.mxu0 }
 0x21b   : > { %2019 = vmatpush.msra.mxu3 %v4659_v42  ;;  %v2071_v43 = vand.u32 4294901760, %v2070_v3  ;;  %2045 = vmatpush.msrb.mxu2 %v4672_v49  ;;  %v1551_v42 = vadd.f32 %v4629_v36, %v4631_v58  ;;  %v1730_v9 = vadd.f32 %v1729_v59, %v1669_v46  ;;  %v1614_v58 = vpop.f32.mrf.mxu2  ;;  %v1680_v50 = vpop.f32.mrf.mxu3 }
 0x21c   : > { %1971 = vmatmul.f32.vlgmr.msrb.gmra.mxu3 %v1886_v56  ;;  %1998 = vmatmul.f32.vlgmr.msra.gmra.mxu2 %v4649_v30 }
 0x21d   : > { %2102 = vmatpush.msra.mxu2 %v2070_v3  ;;  %v2072_v57 = vsub.f32 %v2070_v3, %v2071_v43  ;;  %v1610_v11 = vadd.f32 %v1609_v15, %v1551_v42  ;;  %v1781_v54 = vadd.f32 %v1780_v24, %v1730_v9  ;;  %v1555_v3 = vadd.f32 %v4633_v53, %v4637_v20  ;;  %v273_v20 = vld [vmem:[%s5066_s3 + $0x28] sm:$0xff] }
 0x21e   : > { %v4743_v53 = vand.u32 4294901760, %v2188_v62  ;;  %v4751_v14 = vand.u32 4294901760, %v273_v20 }
 0x21f   : > { %2105 = vmatpush.msra.mxu2 %v4680_v17  ;;  %v2073_v5 = vand.u32 4294901760, %v2072_v57  ;;  %v1675_v35 = vadd.f32 %v1674_v32, %v1610_v11  ;;  %v4719_v17 = vld [vmem:[%s5065_s2 + $0x8] sm:$0xff]  ;;  %v4722_v24 = vand.u32 4294901760, %v1781_v54  ;;  %v4734_v32 = vld [vmem:[%s5065_s2 + $0x10] sm:$0xff]  ;;  %v1615_v46 = vadd.f32 %v1614_v58, %v1555_v3  ;;  %v272_v57 = vld [vmem:[%s5066_s3 + $0x20] sm:$0xff] }
 0x220   : > { %v1784_v56 = vpop.f32.mrf.mxu1  ;;  %v1834_v15 = vmul.f32 %v4719_v17, %v1829_v37  ;;  %v1559_v11 = vadd.f32 %v4644_v34, %v4646_v8  ;;  %v4766_v34 = vsub.f32 %v273_v20, %v4751_v14 }
 0x221   : > { %2074 = vmatpush.msrb.mxu3 %v2073_v5  ;;  %v1681_v42 = vadd.f32 %v1680_v50, %v1615_v46 }
 0x222   : > { %v1733_v36 = vpop.f32.mrf.mxu0  ;;  %v1838_v27 = vadd.f32 %v1834_v15, %v1814_v55 }
 0x223   : > { %v1734_v25 = vadd.f32 %v1733_v36, %v1675_v35  ;;  %2080 = vmatpush.msrb.mxu3 %v2079_v61  ;;  %v1619_v60 = vpop.f32.mrf.mxu2  ;;  %v1686_v35 = vpop.f32.mrf.mxu3 }
 0x224   : > { %2021 = vmatmul.f32.vlgmr.msra.gmra.mxu3 %v4649_v30  ;;  %2051 = vmatmul.f32.vlgmr.msrb.gmra.mxu2 %v2050_v41  ;;  %v1853_v30 = vpop.permute.xlu2 %1852  ;;  %v1620_v61 = vadd.f32 %v1619_v60, %v1559_v11 }
 0x225   : > { %v1785_v48 = vadd.f32 %v1784_v56, %v1734_v25  ;;  %2127 = vmatpush.msra.mxu3 %v4684_v2  ;;  %2154 = vmatpush.msrb.mxu2 %v2071_v43  ;;  %v1858_v59 = vmul.f32 %v4734_v32, %v1853_v30  ;;  %v2238_v43 = vsub.f32 %v1781_v54, %v4722_v24  ;;  %v4761_v54 = vand.u32 4294901760, %v272_v57 }
 0x226   : > { %v4758_v56 = vsub.f32 %v2188_v62, %v4743_v53  ;;  %v2614_v30 = vand.u32 4294901760, %v4766_v34 }
 0x227   : > { %v4728_v1 = vand.u32 4294901760, %v1785_v48  ;;  %2129 = vmatpush.msra.mxu3 %v4672_v49  ;;  %2158 = vmatpush.msrb.mxu2 %v2077_v4  ;;  %v1862_v19 = vadd.f32 %v1858_v59, %v1838_v27  ;;  %v2239_v41 = vand.u32 4294901760, %v2238_v43  ;;  %v4772_v55 = vsub.f32 %v272_v57, %v4761_v54 }
 0x228   : > { %v1788_v21 = vpop.f32.mrf.mxu1  ;;  %v2210_v25 = vand.u32 4294901760, %v4758_v56 }
 0x229   : > { %v2232_v44 = vsub.f32 %v1785_v48, %v4728_v1  ;;  %2341 = vmatpush.msra.mxu1 %v4728_v1  ;;  %v2350_v8 = vsel %vm298_vm0, %v1862_v19, 0  ;;  %v2240_v39 = vsub.f32 %v2238_v43, %v2239_v41  ;;  %v2620_v27 = vand.u32 4294901760, %v4772_v55 }
 0x22a   : > { %v1737_v4 = vpop.f32.mrf.mxu0  ;;  %v4774_v48 = vand.u32 4294901760, %v2350_v8 }
 0x22b   : > { %v2233_v9 = vand.u32 4294901760, %v2232_v44  ;;  %2343 = vmatpush.msra.mxu1 %v4722_v24  ;;  %v1738_v5 = vadd.f32 %v1737_v4, %v1681_v42  ;;  %v2241_v59 = vand.u32 4294901760, %v2240_v39 }
 0x22c   : > { %2082 = vmatmul.f32.vlgmr.msrb.gmra.mxu3 %v4670_v6  ;;  %2108 = vmatmul.f32.vlgmr.msra.gmra.mxu2 %v4675_v0  ;;  %v2371_v0 = vsub.f32 %v2350_v8, %v4774_v48 }
 0x22d   : > { %2179 = vmatpush.msrb.mxu3 %v4684_v2  ;;  %2205 = vmatpush.msra.mxu2 %v4728_v1  ;;  %v2234_v58 = vsub.f32 %v2232_v44, %v2233_v9  ;;  %v1687_v2 = vadd.f32 %v1686_v35, %v1620_v61  ;;  %v1789_v36 = vadd.f32 %v1788_v21, %v1738_v5 }
 0x22e   : > { %2345 = vmatmul.f32.vlgmr.msra.gmra.mxu1 %v4743_v53  ;;  %2316 = vmatpush.msra.mxu0 %v2233_v9  ;;  %v2211_v21 = vsub.f32 %v4758_v56, %v2210_v25  ;;  %v2372_v57 = vand.u32 4294901760, %v2371_v0 }
 0x22f   : > { %2181 = vmatpush.msrb.mxu3 %v4672_v49  ;;  %2207 = vmatpush.msra.mxu2 %v4722_v24  ;;  %v2235_v15 = vand.u32 4294901760, %v2234_v58  ;;  %v2368_v62 = vand.u32 4294901760, %v1789_v36 }
 0x230   : > { %2320 = vmatpush.msra.mxu0 %v2239_v41  ;;  %v1792_v50 = vpop.f32.mrf.mxu1  ;;  %v2212_v42 = vand.u32 4294901760, %v2211_v21 }
 0x231   : > { %2322 = vmatmul.f32.vlgmr.msra.gmra.mxu0 %v4743_v53  ;;  %v2400_v20 = vsub.f32 %v1789_v36, %v2368_v62 }
 0x232   : > { %v1741_v37 = vpop.f32.mrf.mxu0 }
 0x233   : > { %v1742_v49 = vadd.f32 %v1741_v37, %v1687_v2 }
 0x234   : > { %2133 = vmatmul.f32.vlgmr.msra.gmra.mxu3 %v2048_v51  ;;  %2160 = vmatmul.f32.vlgmr.msrb.gmra.mxu2 %v4670_v6  ;;  %v2615_v51 = vsub.f32 %v4766_v34, %v2614_v30 }
 0x235   : > { %v1793_v3 = vadd.f32 %v1792_v50, %v1742_v49  ;;  %2236 = vmatpush.msra.mxu3 %v2235_v15  ;;  %2264 = vmatpush.msrb.mxu2 %v2232_v44  ;;  %v2621_v44 = vsub.f32 %v4772_v55, %v2620_v27 }
 0x236   : > { %v2616_v60 = vand.u32 4294901760, %v2615_v51 }
 0x237   : > { %v2366_v46 = vand.u32 4294901760, %v1793_v3  ;;  %2242 = vmatpush.msra.mxu3 %v2241_v59  ;;  %2267 = vmatpush.msrb.mxu2 %v2238_v43  ;;  %v2401_v43 = vand.u32 4294901760, %v2400_v20  ;;  %v2622_v19 = vand.u32 4294901760, %v2621_v44 }
 0x239   : > { %v2394_v4 = vsub.f32 %v1793_v3, %v2366_v46  ;;  %2451 = vmatpush.msrb.mxu1 %v2366_v46  ;;  %v2402_v5 = vsub.f32 %v2400_v20, %v2401_v43 }
 0x23b   : > { %v2395_v9 = vand.u32 4294901760, %v2394_v4  ;;  %2426 = vmatpush.msrb.mxu0 %v2394_v4  ;;  %2453 = vmatpush.msrb.mxu1 %v2368_v62 }
 0x23c   : > { %2183 = vmatmul.f32.vlgmr.msrb.gmra.mxu3 %v4670_v6  ;;  %2213 = vmatmul.f32.vlgmr.msra.gmra.mxu2 %v2212_v42 }
 0x23d   : > { %2289 = vmatpush.msrb.mxu3 %v4728_v1  ;;  %2367 = vmatpush.msra.mxu2 %v2366_v46  ;;  %v2396_v11 = vsub.f32 %v2394_v4, %v2395_v9  ;;  %v2403_v1 = vand.u32 4294901760, %v2402_v5 }
 0x23e   : > { %2457 = vmatmul.f32.vlgmr.msrb.gmra.mxu1 %v2372_v57  ;;  %2429 = vmatpush.msrb.mxu0 %v2400_v20 }
 0x23f   : > { %2291 = vmatpush.msrb.mxu3 %v4722_v24  ;;  %2369 = vmatpush.msra.mxu2 %v2368_v62  ;;  %v2397_v6 = vand.u32 4294901760, %v2396_v11  ;;  %v2373_v24 = vsub.f32 %v2371_v0, %v2372_v57 }
 0x240   : > { %2432 = vmatmul.f32.vlgmr.msrb.gmra.mxu0 %v2371_v0  ;;  %2617 = vmatpush.msra.mxu1 %v2616_v60 }
 0x241   : > { %2530 = vmatpush.msra.mxu0 %v4751_v14  ;;  %v2374_v41 = vand.u32 4294901760, %v2373_v24 }
 0x242   : > { %2623 = vmatpush.msra.mxu1 %v2622_v19 }
 0x243   : > { %2532 = vmatpush.msra.mxu0 %v4761_v54 }
 0x244   : > { %2855 = vmatpush.msrb.mxu1 %v4751_v14  ;;  %2244 = vmatmul.f32.vlgmr.msra.gmra.mxu3 %v4743_v53  ;;  %v5181_v53 = vld [vmem:[#allocation20_spill] sm:$0xff] }
 0x245   : > { %2270 = vmatmul.f32.vlgmr.msrb.gmra.mxu2 %v4758_v56  ;;  %2398 = vmatpush.msra.mxu3 %v2397_v6 }
 0x246   : > { %2478 = vmatpush.msrb.mxu2 %v2395_v9  ;;  %2625 = vmatmul.f32.vlgmr.msra.gmra.mxu1 %v4111_v7 }
 0x247   : > { %2802 = vmatpush.msrb.mxu0 %v2614_v30  ;;  %2404 = vmatpush.msra.mxu3 %v2403_v1 }
 0x248   : > { %2482 = vmatpush.msrb.mxu2 %v2401_v43  ;;  %2538 = vmatmul.f32.vlgmr.msra.gmra.mxu0 %v4136_v26  ;;  %v5171_v26 = vld [vmem:[#allocation15_spill] sm:$0xff] }
 0x249   : > { %2857 = vmatpush.msrb.mxu1 %v4761_v54  ;;  %2806 = vmatpush.msrb.mxu0 %v2620_v27 }
 0x24c   : > { %2295 = vmatmul.f32.vlgmr.msrb.gmra.mxu3 %v2210_v25 }
 0x24d   : > { %2375 = vmatmul.f32.vlgmr.msra.gmra.mxu2 %v2374_v41  ;;  %2503 = vmatpush.msrb.mxu3 %v2366_v46 }
 0x24e   : > { %2673 = vmatpush.msra.mxu2 %v4766_v34  ;;  %2629 = vmatmul.f32.gmra.mxu1 %v4115_v12 }
 0x24f   : > { %2505 = vmatpush.msrb.mxu3 %v2368_v62 }
 0x250   : > { %2676 = vmatpush.msra.mxu2 %v4772_v55  ;;  %2546 = vmatmul.f32.gmra.mxu0 %v4148_v31  ;;  %v5174_v31 = vld [vmem:[#allocation10_spill] sm:$0xff] }
 0x254   : > { %2406 = vmatmul.f32.vlgmr.msra.gmra.mxu3 %v4774_v48 }
 0x255   : > { %2484 = vmatmul.f32.vlgmr.msrb.gmra.mxu2 %v4774_v48  ;;  %2733 = vmatpush.msra.mxu3 %v4751_v14  ;;  %v5182_v14 = vld [vmem:[#allocation18_spill] sm:$0xff] }
 0x256   : > { %2633 = vmatmul.f32.gmra.mxu1 %v4134_v23 }
 0x257   : > { %2735 = vmatpush.msra.mxu3 %v4761_v54 }
 0x258   : > { %2554 = vmatmul.f32.gmra.mxu0 %v4166_v38  ;;  %v5175_v38 = vld [vmem:[#allocation19_spill] sm:$0xff] }
 0x25c   : > { %2507 = vmatmul.f32.vlgmr.msrb.gmra.mxu3 %v4774_v48 }
 0x25d   : > { %2679 = vmatmul.f32.vlgmr.msra.gmra.mxu2 %v4118_v13  ;;  %v5170_v13 = vld [vmem:[#allocation8_spill] sm:$0xff] }
 0x25e   : > { %2637 = vmatmul.f32.gmra.mxu1 %v4154_v33 }
 0x260   : > { %2562 = vmatmul.f32.gmra.mxu0 %v4184_v45  ;;  %v5178_v45 = vld [vmem:[#allocation12_spill] sm:$0xff] }
 0x264   : > { %2739 = vmatmul.f32.vlgmr.msra.gmra.mxu3 %v4125_v18  ;;  %v5173_v18 = vld [vmem:[#allocation11_spill] sm:$0xff] }
 0x265   : > { %2684 = vmatmul.f32.gmra.mxu2 %v4121_v16  ;;  %v5172_v16 = vld [vmem:[#allocation21_spill] sm:$0xff] }
 0x266   : > { %2641 = vmatmul.f32.gmra.mxu1 %v4172_v40 }
 0x268   : > { %2570 = vmatmul.f32.gmra.mxu0 %v4202_v52  ;;  %v5179_v52 = vld [vmem:[#allocation16_spill] sm:$0xff] }
 0x26c   : > { %2745 = vmatmul.f32.gmra.mxu3 %v4132_v22  ;;  %v5177_v22 = vld [vmem:[#allocation13_spill] sm:$0xff] }
 0x26d   : > { %2689 = vmatmul.f32.gmra.mxu2 %v4143_v29  ;;  %v5176_v29 = vld [vmem:[#allocation23_spill] sm:$0xff] }
 0x26e   : > { %2645 = vmatmul.f32.gmra.mxu1 %v4190_v47 }
 0x270   : > { %2578 = vmatmul.f32.gmra.mxu0 %v5130_v28  ;;  %v5180_v28 = vld [vmem:[#allocation14_spill] sm:$0xff] }
 0x274   : > { %2751 = vmatmul.f32.gmra.mxu3 %v5170_v13 }
 0x275   : > { %2694 = vmatmul.f32.gmra.mxu2 %v5131_v63 }
 0x276   : > { %2649 = vmatmul.f32.gmra.mxu1 %v5171_v26 }
 0x278   : > { %2586 = vmatmul.f32.gmra.mxu0 %v5172_v16 }
 0x27c   : > { %2757 = vmatmul.f32.gmra.mxu3 %v5174_v31 }
 0x27d   : > { %2699 = vmatmul.f32.gmra.mxu2 %v5173_v18 }
 0x27e   : > { %2653 = vmatmul.f32.gmra.mxu1 %v5175_v38 }
 0x280   : > { %2594 = vmatmul.f32.gmra.mxu0 %v5176_v29 }
 0x284   : > { %2763 = vmatmul.f32.gmra.mxu3 %v5178_v45  ;;  %v2913_v45 = vpop.permute.xlu1 %2912 }
 0x285   : > { %2704 = vmatmul.f32.gmra.mxu2 %v5177_v22 }
 0x286   : > { %2859 = vmatmul.f32.vlgmr.msrb.gmra.mxu1 %v4111_v7 }
 0x288   : > { %2808 = vmatmul.f32.vlgmr.msrb.gmra.mxu0 %v4111_v7  ;;  %v5183_v7 = vld [vmem:[#allocation22_spill] sm:$0xff] }
 0x28c   : > { %2769 = vmatmul.f32.gmra.mxu3 %v5180_v28 }
 0x28d   : > { %2709 = vmatmul.f32.gmra.mxu2 %v5179_v52  ;;  %v2893_v52 = vpop.permute.xlu0 %2892 }
 0x28e   : > { %2863 = vmatmul.f32.gmra.mxu1 %v4115_v12 }
 0x28f   : > { %v4837_v63 = vpop.f32.mrf.mxu2 }
 0x290   : > { %2812 = vmatmul.f32.gmra.mxu0 %v4115_v12 }
 0x294   : > { %2775 = vmatmul.f32.gmra.mxu3 %v5182_v14  ;;  %v2927_v14 = vmul.f32 %v4719_v17, %v2913_v45 }
 0x295   : > { %2714 = vmatmul.f32.gmra.mxu2 %v5181_v53 }
 0x296   : > { %2867 = vmatmul.f32.gmra.mxu1 %v4134_v23 }
 0x297   : > { %v4843_v56 = vpop.f32.mrf.mxu3  ;;  %v4845_v35 = vpop.f32.mrf.mxu2 }
 0x298   : > { %2816 = vmatmul.f32.gmra.mxu0 %v4134_v23 }
 0x29c   : > { %2781 = vmatmul.f32.gmra.mxu3 %v5183_v7  ;;  %v2907_v7 = vmul.f32 %v4712_v10, %v2893_v52 }
 0x29e   : > { %2871 = vmatmul.f32.gmra.mxu1 %v4154_v33 }
 0x29f   : > { %v4850_v54 = vpop.f32.mrf.mxu3  ;;  %v4852_v61 = vpop.f32.mrf.mxu2 }
 0x2a0   : > { %2820 = vmatmul.f32.gmra.mxu0 %v4154_v33 }
 0x2a6   : > { %2875 = vmatmul.f32.gmra.mxu1 %v4172_v40 }
 0x2a7   : > { %v4856_v12 = vpop.f32.mrf.mxu3  ;;  %v2052_v58 = vpop.f32.mrf.mxu2 }
 0x2a8   : > { %2824 = vmatmul.f32.gmra.mxu0 %v4172_v40 }
 0x2ab   : > { %v2346_v2 = vpop.f32.mrf.mxu1 }
 0x2ae   : > { %2879 = vmatmul.f32.gmra.mxu1 %v4190_v47  ;;  %v2323_v36 = vpop.f32.mrf.mxu0 }
 0x2af   : > { %v2083_v23 = vpop.f32.mrf.mxu3  ;;  %v2109_v34 = vpop.f32.mrf.mxu2 }
 0x2b0   : > { %2828 = vmatmul.f32.gmra.mxu0 %v4190_v47  ;;  %v2084_v8 = vadd.f32 %v2083_v23, %v2052_v58 }
 0x2b2   : > { %v2110_v39 = vadd.f32 %v2109_v34, %v2084_v8  ;;  %v2937_v34 = vpop.permute.xlu2 %2936 }
 0x2b3   : > { %v2951_v8 = vmul.f32 %v4734_v32, %v2937_v34 }
 0x2b6   : > { %2883 = vmatmul.f32.gmra.mxu1 %v5171_v26 }
 0x2b7   : > { %v2134_v33 = vpop.f32.mrf.mxu3  ;;  %v2161_v25 = vpop.f32.mrf.mxu2 }
 0x2b8   : > { %2832 = vmatmul.f32.gmra.mxu0 %v5171_v26  ;;  %v2135_v37 = vadd.f32 %v2134_v33, %v2110_v39 }
 0x2ba   : > { %v2162_v50 = vadd.f32 %v2161_v25, %v2135_v37 }
 0x2bb   : > { %v2458_v55 = vpop.f32.mrf.mxu1 }
 0x2bd   : > { %v2433_v40 = vpop.f32.mrf.mxu0 }
 0x2be   : > { %2887 = vmatmul.f32.gmra.mxu1 %v5175_v38 }
 0x2bf   : > { %v2184_v49 = vpop.f32.mrf.mxu3  ;;  %v2214_v15 = vpop.f32.mrf.mxu2 }
 0x2c0   : > { %2836 = vmatmul.f32.gmra.mxu0 %v5175_v38  ;;  %v4865_v47 = vadd.f32 %v2184_v49, %v2162_v50 }
 0x2c3   : > { %v2626_v48 = vpop.f32.mrf.mxu1 }
 0x2c5   : > { %v2539_v30 = vpop.f32.mrf.mxu0 }
 0x2c6   : > { %v2627_v62 = vadd.f32 %v2626_v48, %v2539_v30 }
 0x2c7   : > { %v2245_v3 = vpop.f32.mrf.mxu3 }
 0x2c8   : > { %v2246_v59 = vadd.f32 %v2245_v3, %v2214_v15  ;;  %v2271_v21 = vpop.f32.mrf.mxu2 }
 0x2ca   : > { %v2272_v27 = vadd.f32 %v2271_v21, %v2246_v59 }
 0x2cb   : > { %v2630_v46 = vpop.f32.mrf.mxu1 }
 0x2cd   : > { %v2547_v0 = vpop.f32.mrf.mxu0 }
 0x2cf   : > { %v2296_v51 = vpop.f32.mrf.mxu3 }
 0x2d0   : > { %v2297_v20 = vadd.f32 %v2296_v51, %v2272_v27  ;;  %v2376_v42 = vpop.f32.mrf.mxu2  ;;  %v2631_v27 = vadd.f32 %v2630_v46, %v2547_v0 }
 0x2d2   : > { %v2324_v4 = vadd.f32 %v2323_v36, %v2297_v20  ;;  %v2917_v20 = vpop.permute.xlu2 %2916 }
 0x2d3   : > { %v2634_v44 = vpop.f32.mrf.mxu1 }
 0x2d4   : > { %v4867_v9 = vadd.f32 %v2346_v2, %v2324_v4  ;;  %v2931_v2 = vadd.f32 %v2927_v14, %v2907_v7  ;;  %v2897_v4 = vpop.permute.xlu1 %2896 }
 0x2d5   : > { %v2555_v57 = vpop.f32.mrf.mxu0 }
 0x2d6   : > { %v4869_v60 = vadd.f32 %v2634_v44, %v2555_v57  ;;  %v2955_v33 = vadd.f32 %v2951_v8, %v2931_v2  ;;  %v2928_v44 = vmul.f32 %v4719_v17, %v2917_v20 }
 0x2d7   : > { %v2407_v43 = vpop.f32.mrf.mxu3 }
 0x2d8   : > { %v2408_v19 = vadd.f32 %v2407_v43, %v2376_v42  ;;  %v2485_v1 = vpop.f32.mrf.mxu2  ;;  %v2960_v50 = vsel %vm298_vm0, %v2955_v33, 0 }
 0x2da   : > { %v2434_v11 = vadd.f32 %v2433_v40, %v2408_v19  ;;  %v4893_v40 = vand.u32 4294901760, %v2960_v50 }
 0x2db   : > { %v4871_v5 = vpop.f32.mrf.mxu1 }
 0x2dc   : > { %v2459_v6 = vadd.f32 %v2458_v55, %v2434_v11  ;;  %v4896_v59 = vsub.f32 %v2960_v50, %v4893_v40 }
 0x2dd   : > { %v4873_v24 = vpop.f32.mrf.mxu0 }
 0x2de   : > { %v2486_v41 = vadd.f32 %v2485_v1, %v2459_v6  ;;  %v2982_v57 = vand.u32 4294901760, %v4896_v59  ;;  %v2941_v1 = vpop.permute.xlu0 %2940  ;;  %v2639_v50 = vadd.f32 %v4871_v5, %v4873_v24  ;;  %v2901_v24 = vpop.permute.xlu1 %2900 }
 0x2df   : > { %v2508_v13 = vpop.f32.mrf.mxu3  ;;  %v2952_v0 = vmul.f32 %v4734_v32, %v2941_v1 }
 0x2e0   : > { %v4875_v26 = vadd.f32 %v2508_v13, %v2486_v41  ;;  %v2680_v22 = vpop.f32.mrf.mxu2  ;;  %v2983_v46 = vsub.f32 %v4896_v59, %v2982_v57 }
 0x2e1   : > { %v2681_v55 = vadd.f32 %v2680_v22, %v2627_v62  ;;  %v2908_v62 = vmul.f32 %v4712_v10, %v2897_v4 }
 0x2e2   : > { %v2984_v7 = vand.u32 4294901760, %v2983_v46 }
 0x2e3   : > { %v2642_v16 = vpop.f32.mrf.mxu1  ;;  %v2932_v13 = vadd.f32 %v2928_v44, %v2908_v62 }
 0x2e5   : > { %v2571_v18 = vpop.f32.mrf.mxu0 }
 0x2e6   : > { %v4877_v31 = vadd.f32 %v2642_v16, %v2571_v18 }
 0x2e7   : > { %v2740_v28 = vpop.f32.mrf.mxu3 }
 0x2e8   : > { %v2685_v36 = vpop.f32.mrf.mxu2  ;;  %v2741_v15 = vadd.f32 %v2740_v28, %v2681_v55 }
 0x2e9   : > { %v2686_v42 = vadd.f32 %v2685_v36, %v2631_v27 }
 0x2eb   : > { %v4879_v38 = vpop.f32.mrf.mxu1 }
 0x2ed   : > { %v4881_v29 = vpop.f32.mrf.mxu0 }
 0x2ef   : > { %v2746_v25 = vpop.f32.mrf.mxu3 }
 0x2f0   : > { %v2690_v48 = vpop.f32.mrf.mxu2  ;;  %v2747_v19 = vadd.f32 %v2746_v25, %v2686_v42 }
 0x2f1   : > { %v2691_v52 = vadd.f32 %v2690_v48, %v4869_v60 }
 0x2f3   : > { %v2650_v53 = vpop.f32.mrf.mxu1 }
 0x2f5   : > { %v2587_v58 = vpop.f32.mrf.mxu0 }
 0x2f6   : > { %v4885_v23 = vadd.f32 %v2650_v53, %v2587_v58  ;;  %v2956_v53 = vadd.f32 %v2952_v0, %v2932_v13  ;;  %v2921_v13 = vpop.permute.xlu2 %2920 }
 0x2f7   : > { %v2752_v21 = vpop.f32.mrf.mxu3 }
 0x2f8   : > { %v2695_v16 = vpop.f32.mrf.mxu2  ;;  %v2753_v58 = vadd.f32 %v2752_v21, %v2691_v52  ;;  %v3122_v25 = vsel %vm298_vm0, %v2956_v53, 0  ;;  %v2909_v52 = vmul.f32 %v4712_v10, %v2901_v24 }
 0x2f9   : > { %v2696_v48 = vadd.f32 %v2695_v16, %v2639_v50 }
 0x2fb   : > { %v4888_v39 = vpop.f32.mrf.mxu1 }
 0x2fd   : > { %v4890_v37 = vpop.f32.mrf.mxu0 }
 0x2ff   : > { %v2758_v45 = vpop.f32.mrf.mxu3 }
 0x303   : > { %v2860_v49 = vpop.f32.mrf.mxu1 }
 0x305   : > { %v2809_v30 = vpop.f32.mrf.mxu0 }
 0x306   : > { %v2810_v3 = vadd.f32 %v2809_v30, %v2741_v15  ;;  %v2700_v15 = vpop.f32.mrf.mxu2 }
 0x307   : > { %v2764_v21 = vpop.f32.mrf.mxu3  ;;  %v2701_v46 = vadd.f32 %v2700_v15, %v4877_v31  ;;  %v2905_v15 = vpop.permute.xlu2 %2904 }
 0x308   : > { %v2861_v51 = vadd.f32 %v2860_v49, %v2810_v3  ;;  %v4913_v3 = vand.u32 4294901760, %v3122_v25 }
 0x309   : > { %v2765_v53 = vadd.f32 %v2764_v21, %v2701_v46  ;;  %v2910_v21 = vmul.f32 %v4712_v10, %v2905_v15 }
 0x30a   : > { %v4901_v11 = vand.u32 4294901760, %v2861_v51  ;;  %v4918_v44 = vsub.f32 %v3122_v25, %v4913_v3 }
 0x30b   : > { %v2864_v43 = vpop.f32.mrf.mxu1 }
 0x30c   : > { %v3010_v18 = vsub.f32 %v2861_v51, %v4901_v11  ;;  %v2759_v51 = vadd.f32 %v2758_v45, %v2696_v48  ;;  %v2929_v45 = vmul.f32 %v4719_v17, %v2921_v13  ;;  %v2925_v48 = vpop.permute.xlu0 %2924 }
 0x30d   : > { %v2813_v6 = vpop.f32.mrf.mxu0 }
 0x30e   : > { %v2814_v41 = vadd.f32 %v2813_v6, %v2747_v19  ;;  %v3011_v8 = vand.u32 4294901760, %v3010_v18  ;;  %v3144_v6 = vand.u32 4294901760, %v4918_v44  ;;  %v2705_v1 = vpop.f32.mrf.mxu2 }
 0x310   : > { %v2865_v22 = vadd.f32 %v2864_v43, %v2814_v41  ;;  %v3012_v49 = vsub.f32 %v3010_v18, %v3011_v8  ;;  %v3145_v31 = vsub.f32 %v4918_v44, %v3144_v6 }
 0x312   : > { %v2976_v28 = vand.u32 4294901760, %v2865_v22  ;;  %v3013_v4 = vand.u32 4294901760, %v3012_v49  ;;  %v3146_v25 = vand.u32 4294901760, %v3145_v31 }
 0x313   : > { %v2868_v14 = vpop.f32.mrf.mxu1 }
 0x314   : > { %v3004_v34 = vsub.f32 %v2865_v22, %v2976_v28  ;;  %2977 = vmatpush.msrb.mxu2 %v2976_v28 }
 0x315   : > { %v2817_v2 = vpop.f32.mrf.mxu0 }
 0x316   : > { %v3005_v36 = vand.u32 4294901760, %v3004_v34  ;;  %v2818_v33 = vadd.f32 %v2817_v2, %v2753_v58  ;;  %2979 = vmatpush.msrb.mxu2 %v4901_v11 }
 0x317   : > { %2985 = vmatmul.f32.vlgmr.msrb.gmra.mxu2 %v2984_v7 }
 0x318   : > { %v3006_v60 = vsub.f32 %v3004_v34, %v3005_v36  ;;  %v2869_v55 = vadd.f32 %v2868_v14, %v2818_v33  ;;  %3036 = vmatpush.msra.mxu2 %v3004_v34 }
 0x31a   : > { %3039 = vmatpush.msra.mxu2 %v3010_v18  ;;  %v3007_v30 = vand.u32 4294901760, %v3006_v60  ;;  %v4915_v20 = vand.u32 4294901760, %v2869_v55  ;;  %v2770_v18 = vpop.f32.mrf.mxu3 }
 0x31b   : > { %v2872_v27 = vpop.f32.mrf.mxu1 }
 0x31c   : > { %3088 = vmatpush.msrb.mxu2 %v3005_v36  ;;  %3008 = vmatpush.msrb.mxu3 %v3007_v30  ;;  %v3172_v62 = vsub.f32 %v2869_v55, %v4915_v20  ;;  %v2710_v55 = vpop.f32.mrf.mxu2 }
 0x31d   : > { %v2821_v5 = vpop.f32.mrf.mxu0 }
 0x31e   : > { %3092 = vmatpush.msrb.mxu2 %v3011_v8  ;;  %v2822_v42 = vadd.f32 %v2821_v5, %v2759_v51  ;;  %3014 = vmatpush.msrb.mxu3 %v3013_v4  ;;  %v3173_v16 = vand.u32 4294901760, %v3172_v62  ;;  %v2933_v8 = vadd.f32 %v2929_v45, %v2909_v52 }
 0x31f   : > { %3016 = vmatmul.f32.vlgmr.msrb.gmra.mxu3 %v4893_v40  ;;  %3042 = vmatmul.f32.vlgmr.msra.gmra.mxu2 %v4896_v59 }
 0x320   : > { %v2873_v43 = vadd.f32 %v2872_v27, %v2822_v42  ;;  %3061 = vmatpush.msra.mxu3 %v2976_v28  ;;  %v3174_v34 = vsub.f32 %v3172_v62, %v3173_v16  ;;  %v2930_v27 = vmul.f32 %v4719_v17, %v2925_v48  ;;  %v2711_v17 = vadd.f32 %v2710_v55, %v4885_v23 }
 0x321   : > { %v2655_v23 = vadd.f32 %v4888_v39, %v4890_v37 }
 0x322   : > { %v4923_v19 = vand.u32 4294901760, %v2873_v43  ;;  %3063 = vmatpush.msra.mxu3 %v4901_v11  ;;  %v3175_v60 = vand.u32 4294901760, %v3174_v34  ;;  %v2776_v30 = vpop.f32.mrf.mxu3  ;;  %v2934_v10 = vadd.f32 %v2930_v27, %v2910_v21  ;;  %v5184_v21 = vld [vmem:[#allocation17_spill] sm:$0xff] }
 0x323   : > { %v2876_v41 = vpop.f32.mrf.mxu1  ;;  %v2777_v46 = vadd.f32 %v2776_v30, %v2711_v17  ;;  %v5185_v27 = vld [vmem:[#allocation9_spill] sm:$0xff] }
 0x324   : > { %3113 = vmatpush.msrb.mxu3 %v2976_v28  ;;  %v3166_v0 = vsub.f32 %v2873_v43, %v4923_v19  ;;  %3139 = vmatpush.msra.mxu2 %v4923_v19  ;;  %v2945_v28 = vpop.permute.xlu1 %2944 }
 0x325   : > { %v2825_v22 = vpop.f32.mrf.mxu0  ;;  %v2953_v2 = vmul.f32 %v4734_v32, %v2945_v28 }
 0x326   : > { %3115 = vmatpush.msrb.mxu3 %v4901_v11  ;;  %v3167_v14 = vand.u32 4294901760, %v3166_v0  ;;  %3141 = vmatpush.msra.mxu2 %v4915_v20  ;;  %v2647_v11 = vadd.f32 %v4879_v38, %v4881_v29  ;;  %v2826_v58 = vadd.f32 %v2825_v22, %v2765_v53 }
 0x327   : > { %3067 = vmatmul.f32.vlgmr.msra.gmra.mxu3 %v2982_v57  ;;  %3094 = vmatmul.f32.vlgmr.msrb.gmra.mxu2 %v4893_v40  ;;  %v2957_v38 = vadd.f32 %v2953_v2, %v2933_v8 }
 0x328   : > { %v3168_v7 = vsub.f32 %v3166_v0, %v3167_v14  ;;  %3198 = vmatpush.msrb.mxu2 %v3166_v0  ;;  %v2706_v36 = vadd.f32 %v2705_v1, %v2647_v11  ;;  %v2877_v57 = vadd.f32 %v2876_v41, %v2826_v58 }
 0x329   : > { %v3284_v5 = vsel %vm298_vm0, %v2957_v38, 0 }
 0x32a   : > { %3201 = vmatpush.msrb.mxu2 %v3172_v62  ;;  %v3169_v33 = vand.u32 4294901760, %v3168_v7  ;;  %v2771_v59 = vadd.f32 %v2770_v18, %v2706_v36  ;;  %v4946_v51 = vand.u32 4294901760, %v2877_v57  ;;  %v4958_v41 = vand.u32 4294901760, %v3284_v5  ;;  %v2782_v52 = vpop.f32.mrf.mxu3 }
 0x32b   : > { %v2880_v50 = vpop.f32.mrf.mxu1 }
 0x32c   : > { %3170 = vmatpush.msra.mxu3 %v3169_v33  ;;  %v2949_v24 = vpop.permute.xlu1 %2948  ;;  %v3334_v43 = vsub.f32 %v2877_v57, %v4946_v51  ;;  %v3305_v45 = vsub.f32 %v3284_v5, %v4958_v41 }
 0x32d   : > { %v2829_v49 = vpop.f32.mrf.mxu0 }
 0x32e   : > { %v2830_v29 = vadd.f32 %v2829_v49, %v2771_v59  ;;  %3176 = vmatpush.msra.mxu3 %v3175_v60  ;;  %v3335_v22 = vand.u32 4294901760, %v3334_v43  ;;  %v3306_v28 = vand.u32 4294901760, %v3305_v45 }
 0x32f   : > { %3117 = vmatmul.f32.vlgmr.msrb.gmra.mxu3 %v4893_v40  ;;  %3147 = vmatmul.f32.vlgmr.msra.gmra.mxu2 %v3146_v25  ;;  %v2954_v40 = vmul.f32 %v4734_v32, %v2949_v24 }
 0x330   : > { %v2881_v4 = vadd.f32 %v2880_v50, %v2830_v29  ;;  %3223 = vmatpush.msrb.mxu3 %v4923_v19  ;;  %3250 = vmatpush.msra.mxu2 %v3167_v14  ;;  %v3336_v31 = vsub.f32 %v3334_v43, %v3335_v22  ;;  %v3307_v33 = vsub.f32 %v3305_v45, %v3306_v28 }
 0x331   : > { %v2958_v32 = vadd.f32 %v2954_v40, %v2934_v10  ;;  %v5187_v10 = vld [vmem:[#allocation25_spill] sm:$0xff] }
 0x332   : > { %v4950_v42 = vand.u32 4294901760, %v2881_v4  ;;  %3225 = vmatpush.msrb.mxu3 %v4915_v20  ;;  %3254 = vmatpush.msra.mxu2 %v3173_v16  ;;  %v2715_v16 = vpop.f32.mrf.mxu2  ;;  %v3337_v36 = vand.u32 4294901760, %v3336_v31  ;;  %v3308_v60 = vand.u32 4294901760, %v3307_v33 }
 0x333   : > { %v2884_v62 = vpop.f32.mrf.mxu1  ;;  %v2716_v53 = vadd.f32 %v2715_v16, %v2655_v23  ;;  %v3446_v39 = vsel %vm298_vm0, %v2958_v32, 0  ;;  %v5189_v32 = vld [vmem:[#allocation27_spill] sm:$0xff] }
 0x334   : > { %v3328_v1 = vsub.f32 %v2881_v4, %v4950_v42  ;;  %3437 = vmatpush.msra.mxu1 %v4950_v42  ;;  %v3466_v8 = vand.u32 4294901760, %v3446_v39  ;;  %v1922_v4 = vadd.f32 %v4843_v56, %v4837_v63 }
 0x335   : > { %v2833_v13 = vpop.f32.mrf.mxu0  ;;  %v2783_v37 = vadd.f32 %v2782_v52, %v2716_v53 }
 0x336   : > { %v3329_v0 = vand.u32 4294901760, %v3328_v1  ;;  %3439 = vmatpush.msra.mxu1 %v4946_v51  ;;  %v2834_v18 = vadd.f32 %v2833_v13, %v2777_v46  ;;  %v3467_v50 = vsub.f32 %v3446_v39, %v3466_v8  ;;  %v5188_v46 = vld [vmem:[#allocation26_spill] sm:$0xff] }
 0x337   : > { %3178 = vmatmul.f32.vlgmr.msra.gmra.mxu3 %v4913_v3  ;;  %3204 = vmatmul.f32.vlgmr.msrb.gmra.mxu2 %v4918_v44 }
 0x338   : > { %3275 = vmatpush.msra.mxu3 %v4923_v19  ;;  %3301 = vmatpush.msrb.mxu2 %v4950_v42  ;;  %v3330_v14 = vsub.f32 %v3328_v1, %v3329_v0  ;;  %v2885_v19 = vadd.f32 %v2884_v62, %v2834_v18  ;;  %v3468_v44 = vand.u32 4294901760, %v3467_v50  ;;  %v1948_v62 = vadd.f32 %v4845_v35, %v1922_v4  ;;  %v284_v18 = vpop.permute.xlu2 %283 }
 0x339   : > { %3412 = vmatpush.msra.mxu0 %v3329_v0  ;;  %3441 = vmatmul.f32.vlgmr.msra.gmra.mxu1 %v4958_v41 }
 0x33a   : > { %3277 = vmatpush.msra.mxu3 %v4915_v20  ;;  %3303 = vmatpush.msrb.mxu2 %v4946_v51  ;;  %v3331_v34 = vand.u32 4294901760, %v3330_v14  ;;  %v3464_v20 = vand.u32 4294901760, %v2885_v19  ;;  %v3469_v29 = vsub.f32 %v3467_v50, %v3468_v44 }
 0x33b   : > { %3416 = vmatpush.msra.mxu0 %v3335_v22  ;;  %v2888_v7 = vpop.f32.mrf.mxu1 }
 0x33c   : > { %3418 = vmatmul.f32.vlgmr.msra.gmra.mxu0 %v4958_v41  ;;  %v3496_v59 = vsub.f32 %v2885_v19, %v3464_v20  ;;  %v3470_v48 = vand.u32 4294901760, %v3469_v29 }
 0x33d   : > { %v2837_v11 = vpop.f32.mrf.mxu0 }
 0x33e   : > { %v2838_v58 = vadd.f32 %v2837_v11, %v2783_v37  ;;  %v5190_v37 = vld [vmem:[#allocation28_spill] sm:$0xff] }
 0x33f   : > { %3229 = vmatmul.f32.vlgmr.msrb.gmra.mxu3 %v3144_v6  ;;  %3256 = vmatmul.f32.vlgmr.msra.gmra.mxu2 %v4913_v3  ;;  %v3497_v6 = vand.u32 4294901760, %v3496_v59 }
 0x340   : > { %v2889_v2 = vadd.f32 %v2888_v7, %v2838_v58  ;;  %3332 = vmatpush.msrb.mxu3 %v3331_v34  ;;  %3360 = vmatpush.msra.mxu2 %v3328_v1  ;;  %v1973_v1 = vadd.f32 %v4850_v54, %v1948_v62  ;;  %v5193_v7 = vld [vmem:[#allocation33_spill] sm:$0xff]  ;;  %v5202_v62 = vld [vmem:[#allocation43_spill] sm:$0xff] }
 0x341   : > { %v3498_v15 = vsub.f32 %v3496_v59, %v3497_v6 }
 0x342   : > { %v3462_v25 = vand.u32 4294901760, %v2889_v2  ;;  %3338 = vmatpush.msrb.mxu3 %v3337_v36  ;;  %3363 = vmatpush.msra.mxu2 %v3334_v43  ;;  %v2000_v63 = vadd.f32 %v4852_v61, %v1973_v1  ;;  %v5191_v61 = vld [vmem:[#allocation29_spill] sm:$0xff] }
 0x343   : > { %v988_v19 = vadd.f32 %v5191_v61, %v5190_v37 }
 0x344   : > { %v3490_v57 = vsub.f32 %v2889_v2, %v3462_v25  ;;  %3547 = vmatpush.msrb.mxu1 %v3462_v25  ;;  %v2023_v22 = vadd.f32 %v4856_v12, %v2000_v63  ;;  %v5192_v12 = vld [vmem:[#allocation32_spill] sm:$0xff]  ;;  %v5205_v63 = vld [vmem:[#allocation34_spill] sm:$0xff] }
 0x345   : > { %v1014_v11 = vadd.f32 %v5192_v12, %v988_v19  ;;  %v5194_v2 = vld [vmem:[#allocation36_spill] sm:$0xff]  ;;  %v5207_v19 = vld [vmem:[#allocation45_spill] sm:$0xff]  ;;  %v296_v12 = vpop.permute.xlu0 %295 }
 0x346   : > { %v3491_v55 = vand.u32 4294901760, %v3490_v57  ;;  %3522 = vmatpush.msrb.mxu0 %v3490_v57  ;;  %3549 = vmatpush.msrb.mxu1 %v3464_v20 }
 0x347   : > { %3279 = vmatmul.f32.vlgmr.msra.gmra.mxu3 %v4913_v3  ;;  %3309 = vmatmul.f32.vlgmr.msrb.gmra.mxu2 %v3308_v60  ;;  %v3499_v3 = vand.u32 4294901760, %v3498_v15  ;;  %v1039_v58 = vadd.f32 %v5193_v7, %v1014_v11  ;;  %v5197_v15 = vld [vmem:[#allocation39_spill] sm:$0xff] }
 0x348   : > { %3385 = vmatpush.msra.mxu3 %v4950_v42  ;;  %3463 = vmatpush.msrb.mxu2 %v3462_v25  ;;  %v3492_v49 = vsub.f32 %v3490_v57, %v3491_v55  ;;  %v5186_v42 = vld [vmem:[#allocation24_spill] sm:$0xff]  ;;  %v288_v57 = vpop.permute.xlu1 %287 }
 0x349   : > { %3525 = vmatpush.msrb.mxu0 %v3496_v59  ;;  %3553 = vmatmul.f32.vlgmr.msrb.gmra.mxu1 %v3468_v44  ;;  %v1066_v36 = vadd.f32 %v5194_v2, %v1039_v58 }
 0x34a   : > { %3387 = vmatpush.msra.mxu3 %v4946_v51  ;;  %3465 = vmatpush.msrb.mxu2 %v3464_v20  ;;  %v3493_v38 = vand.u32 4294901760, %v3492_v49  ;;  %v826_v51 = vadd.f32 %v5185_v27, %v5184_v21  ;;  %v5196_v49 = vld [vmem:[#allocation38_spill] sm:$0xff]  ;;  %v5199_v27 = vld [vmem:[#allocation41_spill] sm:$0xff] }
 0x34b   : > { %3528 = vmatmul.f32.vlgmr.msrb.gmra.mxu0 %v3467_v50 }
 0x34c   : > { %v852_v40 = vadd.f32 %v5186_v42, %v826_v51 }
 0x34e   : > { %v877_v17 = vadd.f32 %v5187_v10, %v852_v40  ;;  %v5201_v40 = vld [vmem:[#allocation42_spill] sm:$0xff] }
 0x34f   : > { %3340 = vmatmul.f32.vlgmr.msrb.gmra.mxu3 %v4958_v41  ;;  %3366 = vmatmul.f32.vlgmr.msra.gmra.mxu2 %v3305_v45  ;;  %v1312_v10 = vadd.f32 %v5202_v62, %v5201_v40 }
 0x350   : > { %3494 = vmatpush.msrb.mxu3 %v3493_v38  ;;  %3574 = vmatpush.msra.mxu2 %v3491_v55  ;;  %v904_v0 = vadd.f32 %v5188_v46, %v877_v17  ;;  %v1150_v38 = vadd.f32 %v5197_v15, %v5196_v49  ;;  %v292_v46 = vpop.permute.xlu2 %291 }
 0x352   : > { %3500 = vmatpush.msrb.mxu3 %v3499_v3  ;;  %3578 = vmatpush.msra.mxu2 %v3497_v6  ;;  %v927_v23 = vadd.f32 %v5189_v32, %v904_v0 }
 0x354   : > { %v1415_v45 = vadd.f32 %v927_v23, %v284_v18 }
 0x356   : > { %v2511_v14 = vadd.f32 %v2023_v22, %v1415_v45 }
 0x357   : > { %3391 = vmatmul.f32.vlgmr.msra.gmra.mxu3 %v3306_v28  ;;  %3471 = vmatmul.f32.vlgmr.msrb.gmra.mxu2 %v3470_v48 }
 0x358   : > { %3599 = vmatpush.msra.mxu3 %v3462_v25  ;;  %v5195_v25 = vld [vmem:[#allocation37_spill] sm:$0xff] }
 0x359   : > { %v1089_v50 = vadd.f32 %v5195_v25, %v1066_v36 }
 0x35a   : > { %3601 = vmatpush.msra.mxu3 %v3464_v20 }
 0x35b   : > { %v1416_v60 = vadd.f32 %v1089_v50, %v288_v57 }
 0x35d   : > { %v2512_v3 = vadd.f32 %v4865_v47, %v1416_v60 }
 0x35f   : > { %3502 = vmatmul.f32.vlgmr.msrb.gmra.mxu3 %v3466_v8  ;;  %3580 = vmatmul.f32.vlgmr.msra.gmra.mxu2 %v3466_v8 }
 0x367   : > { %3603 = vmatmul.f32.vlgmr.msra.gmra.mxu3 %v3466_v8 }
 0x39a   : > { %v2986_v30 = vpop.f32.mrf.mxu2 }
 0x3a2   : > { %v3017_v5 = vpop.f32.mrf.mxu3  ;;  %v3043_v24 = vpop.f32.mrf.mxu2 }
 0x3a3   : > { %v3018_v43 = vadd.f32 %v3017_v5, %v2986_v30  ;;  %v5198_v30 = vld [vmem:[#allocation40_spill] sm:$0xff] }
 0x3a4   : > { %v1176_v21 = vadd.f32 %v5198_v30, %v1150_v38 }
 0x3a5   : > { %v3044_v16 = vadd.f32 %v3043_v24, %v3018_v43  ;;  %v5200_v24 = vld [vmem:[#allocation31_spill] sm:$0xff]  ;;  %v5203_v43 = vld [vmem:[#allocation30_spill] sm:$0xff] }
 0x3a6   : > { %v1201_v51 = vadd.f32 %v5199_v27, %v1176_v21 }
 0x3a8   : > { %v1228_v42 = vadd.f32 %v5200_v24, %v1201_v51 }
 0x3aa   : > { %v3068_v41 = vpop.f32.mrf.mxu3  ;;  %v3095_v13 = vpop.f32.mrf.mxu2  ;;  %v1251_v1 = vadd.f32 %v5203_v43, %v1228_v42 }
 0x3ab   : > { %v3069_v56 = vadd.f32 %v3068_v41, %v3044_v16  ;;  %v5204_v41 = vld [vmem:[#allocation35_spill] sm:$0xff] }
 0x3ac   : > { %v1338_v47 = vadd.f32 %v5204_v41, %v1312_v10  ;;  %v1417_v23 = vadd.f32 %v1251_v1, %v292_v46 }
 0x3ad   : > { %v3096_v35 = vadd.f32 %v3095_v13, %v3069_v56 }
 0x3ae   : > { %v1363_v56 = vadd.f32 %v5205_v63, %v1338_v47 }
 0x3b2   : > { %v3118_v52 = vpop.f32.mrf.mxu3  ;;  %v3148_v53 = vpop.f32.mrf.mxu2 }
 0x3b3   : > { %v3119_v54 = vadd.f32 %v3118_v52, %v3096_v35  ;;  %v2513_v35 = vadd.f32 %v4867_v9, %v1417_v23 }
 0x3b5   : > { %v3607_v39 = vadd.f32 %v3119_v54, %v2511_v14 }
 0x3b6   : > { %v3442_v22 = vpop.f32.mrf.mxu1 }
 0x3b7   : > { %3612 = vst.msk [vmem:[%s4993_s26] sm:$0xff] %vm3611_vm1, %v3607_v39 }
 0x3b9   : > { %v3419_v32 = vpop.f32.mrf.mxu0 }
 0x3ba   : > { %v3179_v31 = vpop.f32.mrf.mxu3  ;;  %v3205_v28 = vpop.f32.mrf.mxu2 }
 0x3bb   : > { %v3180_v34 = vadd.f32 %v3179_v31, %v3148_v53  ;;  %v5206_v53 = vld [vmem:[#allocation44_spill] sm:$0xff] }
 0x3bc   : > { %v1390_v14 = vadd.f32 %v5206_v53, %v1363_v56 }
 0x3bd   : > { %v3206_v33 = vadd.f32 %v3205_v28, %v3180_v34 }
 0x3be   : > { %v1413_v31 = vadd.f32 %v5207_v19, %v1390_v14 }
 0x3c0   : > { %v1418_v58 = vadd.f32 %v1413_v31, %v296_v12 }
 0x3c2   : > { %v3230_v8 = vpop.f32.mrf.mxu3  ;;  %v3257_v20 = vpop.f32.mrf.mxu2 }
 0x3c3   : > { %v3231_v59 = vadd.f32 %v3230_v8, %v3206_v33 }
 0x3c5   : > { %v3258_v55 = vadd.f32 %v3257_v20, %v3231_v59  ;;  %v2514_v20 = vadd.f32 %v4875_v26, %v1418_v58 }
 0x3c6   : > { %v3554_v11 = vpop.f32.mrf.mxu1 }
 0x3c8   : > { %v3529_v61 = vpop.f32.mrf.mxu0 }
 0x3ca   : > { %v3280_v44 = vpop.f32.mrf.mxu3  ;;  %v3310_v6 = vpop.f32.mrf.mxu2 }
 0x3cb   : > { %v3281_v29 = vadd.f32 %v3280_v44, %v3258_v55 }
 0x3cd   : > { %v3608_v48 = vadd.f32 %v3281_v29, %v2512_v3 }
 0x3cf   : > { %3613 = vst.msk [vmem:[%s4993_s26 + $0x8] sm:$0xff] %vm3611_vm1, %v3608_v48 }
 0x3d2   : > { %v3341_v4 = vpop.f32.mrf.mxu3  ;;  %v3367_v5 = vpop.f32.mrf.mxu2 }
 0x3d3   : > { %v3342_v17 = vadd.f32 %v3341_v4, %v3310_v6 }
 0x3d5   : > { %v3368_v13 = vadd.f32 %v3367_v5, %v3342_v17 }
 0x3da   : > { %v3392_v0 = vpop.f32.mrf.mxu3  ;;  %v3472_v45 = vpop.f32.mrf.mxu2 }
 0x3db   : > { %v3393_v16 = vadd.f32 %v3392_v0, %v3368_v13 }
 0x3dd   : > { %v3420_v18 = vadd.f32 %v3419_v32, %v3393_v16 }
 0x3df   : > { %v3443_v52 = vadd.f32 %v3442_v22, %v3420_v18 }
 0x3e1   : > { %v3609_v54 = vadd.f32 %v3443_v52, %v2513_v35 }
 0x3e2   : > { %v3503_v39 = vpop.f32.mrf.mxu3  ;;  %v3581_v9 = vpop.f32.mrf.mxu2 }
 0x3e3   : > { %3614 = vst.msk [vmem:[%s4993_s26 + $0x10] sm:$0xff] %vm3611_vm1, %v3609_v54  ;;  %v3504_v37 = vadd.f32 %v3503_v39, %v3472_v45 }
 0x3e5   : > { %v3530_v28 = vadd.f32 %v3529_v61, %v3504_v37 }
 0x3e7   : > { %v3555_v7 = vadd.f32 %v3554_v11, %v3530_v28 }
 0x3e9   : > { %v3582_v34 = vadd.f32 %v3581_v9, %v3555_v7 }
 0x3ea   : > { %v3604_v8 = vpop.f32.mrf.mxu3 }
 0x3eb   : > { %v3605_v2 = vadd.f32 %v3604_v8, %v3582_v34 }
 0x3ed   : > { %v3610_v36 = vadd.f32 %v3605_v2, %v2514_v20 }
 0x3ef   : > { %3615 = vst.msk [vmem:[%s4993_s26 + $0x18] sm:$0xff] %vm3611_vm1, %v3610_v36 }
 0x3f0   : > { %3922 = shalt.err (!%p3919_p13)
}
 0x3f1   : > { %s3991_s24 = smov 128   ;;  %s3992_s22 = smov 8  }
 0x3f2   : > { %3756 = dma.vmem_to_hbm [thread:$0]  (%p4069_p9), %s3632_s8, 512, %s3634_s9, %s3617_s18, %s3991_s24, %s3991_s24, %s3992_s22  }
 0x3f3 PF: > { %s3648_s26 = sand.u32 1, %s3957_s15   ;;  %p3763_p0 = pnand %p3740_p12, %p4076_p11 }
 0x3f4   : > { %s3649_s6 = scalar_lea.sflag [#allocation4], %s3648_s26 }
 0x3f5   : > { %p3764_p1 = pneg %p3763_p0 }
 0x3f7   : > { %3952 = dma.done.wait (%p3764_p1), %s3649_s6, 512  }
 0x3f8   : > { %3954 = vsyncadd (%p3764_p1), %s3649_s6, 4294966784  ;;  %s20_s20 = sadd.s32 1, %s3977_s20   ;;  %s5208_s15 = smov %s3961_s16 }
 0x3f9   : > { %p17_p2 = scmp.ge.s32.totalorder %s20_s20, 4   ;;  %s5209_s16 = smov %s3965_s17 }
 0x3fa   : > { %s5210_s17 = smov %s4074_s29  ;;  %s5211_s18 = smov %s3973_s19 }
 0x3fb   : > { %s5212_s19 = smov %s5214_s23  ;;  %19 = sbr.rel (!%p17_p2) target bundleno = 6 (0x6), region = 84 }
 0x400   :  { %3655 = vsyncpa [#allocation3], 1 }
 0x401   :  { %3657 = vsyncpa [#allocation3 + $0x1], 1 }
 0x402   :  { %3658 = vsyncpa [#allocation4], 1 }
 0x403   :  { %3660 = vsyncpa [#allocation4 + $0x1], 1 }

</bundles_post_ra>
